<compile_context>
chip_gen: v6e
topology: v6e:2x2x1
jax: 0.10.0
libtpu: 0.0.40
codegen_flags: <defaults>
</compile_context>

<pallas_src>
import jax
import jax.numpy as jnp
from jax import lax
from jax.experimental import pallas as pl
from jax.experimental.pallas import tpu as pltpu


# --------------------------------------------------------------------------
# Fused kernel factory: stacked LSTM (num_layers) + linear head, one grid step.
# --------------------------------------------------------------------------
def _make_fused_kernel(T, B, I, H, O, num_layers):
    def kernel(*refs):
        x_ref = refs[0]                       # (T*B, I)
        w_ih0_ref = refs[1]                   # (I, 4H)   lane-packed gates [i,f,g,o]
        b0_ref = refs[2]                      # (1, 4H)   combined b_ih0 + b_hh0
        w_hh0_ref = refs[3]                   # (H, 4H)
        idx = 4
        upper_refs = []
        for _ in range(num_layers - 1):
            upper_refs.append((refs[idx], refs[idx + 1]))   # (2H,4H), (1,4H)
            idx += 2
        w_reg_ref = refs[idx]                 # (O, H)
        b_reg_ref = refs[idx + 1]             # (1, O)
        out_ref = refs[idx + 2]               # (T*B, O)

        # ---- hoisted (once) loads: lane-dense weights are cheap in vregs ----
        w_hh0 = w_hh0_ref[...]                                 # 4 vregs
        upper = []
        for (w_cat_ref, b_ref) in upper_refs:
            w_cat = w_cat_ref[...]                             # (2H, 4H): 8 vregs
            b_l = jnp.broadcast_to(b_ref[...], (B, 4 * H))     # pre-broadcast once
            upper.append((w_cat, b_l))
        w_reg = w_reg_ref[...]
        b_reg = b_reg_ref[...]

        # ---- layer-0 input projection for the whole sequence (off the chain) ----
        x_flat = x_ref[...].astype(jnp.float32)                # (T*B, I)
        x_proj = jnp.dot(x_flat, w_ih0_ref[...],
                         preferred_element_type=jnp.float32) + b0_ref[...]   # (T*B, 4H)

        # Lane mask selecting the g-gate (tanh) lanes [2H, 3H) of the packed vreg.
        lane = lax.broadcasted_iota(jnp.int32, (B, 4 * H), 1)
        g_mask = (lane >= 2 * H) & (lane < 3 * H)

        def gates_update(pre, c_prev):
            # PyTorch gate order along lanes: [i, f, g, o].
            act = jnp.where(g_mask, jnp.tanh(pre), jax.nn.sigmoid(pre))
            i_g = act[:, 0 * H:1 * H]
            f_g = act[:, 1 * H:2 * H]
            g_g = act[:, 2 * H:3 * H]
            o_g = act[:, 3 * H:4 * H]
            c_new = f_g * c_prev + i_g * g_g
            h_new = o_g * jnp.tanh(c_new)
            return h_new, c_new

        # ---- recurrence: h/c carried in vregs; fully unrolled over T ----
        h = [jnp.zeros((B, H), jnp.float32) for _ in range(num_layers)]
        c = [jnp.zeros((B, H), jnp.float32) for _ in range(num_layers)]
        h_tops = []
        for t in range(T):                    # static unroll: full LLO visibility
            # Layer 0: precomputed x-projection slice (sublane offset t*B, tile
            # aligned) + one recurrent (B,H)@(H,4H) matmul.
            pre0 = x_proj[t * B:(t + 1) * B, :] + jnp.dot(
                h[0], w_hh0, preferred_element_type=jnp.float32)
            h[0], c[0] = gates_update(pre0, c[0])

            # Layers >= 1: fused ih+hh matmul via lane concat and (2H,4H) weight.
            for l in range(1, num_layers):
                w_cat, b_l = upper[l - 1]
                hc = jnp.concatenate([h[l - 1], h[l]], axis=1)      # (B, 2H)
                pre = jnp.dot(hc, w_cat,
                              preferred_element_type=jnp.float32) + b_l
                h[l], c[l] = gates_update(pre, c[l])

            h_tops.append(h[num_layers - 1])

        # ---- regression head as epilogue (no longer on the recurrent chain) ----
        h_all = jnp.concatenate(h_tops, axis=0)                     # (T*B, H)
        if O == 1:
            # VPU multiply + single XLU lane reduce instead of an (H,1) MXU matmul.
            head = jnp.sum(h_all * w_reg, axis=-1, keepdims=True) + b_reg
        else:
            head = lax.dot_general(
                h_all, w_reg, (((1,), (1,)), ((), ())),
                preferred_element_type=jnp.float32) + b_reg
        out_ref[...] = head.astype(out_ref.dtype)   # one store of the whole block

    return kernel


# --------------------------------------------------------------------------
# Wrapper: single pallas_call over prepared (lane-packed, pre-transposed) params.
# --------------------------------------------------------------------------
def lstm_reg_forward(kparams, x):
    """x: (T, B, input_size) -> (T, B, output_size)."""
    T, B, I = x.shape
    H = kparams["w_hh0"].shape[0]
    w_reg = kparams["reg_w"]                 # (O, H)
    b_reg = kparams["reg_b"]                 # (1, O)
    O = w_reg.shape[0]
    num_layers = 1 + len(kparams["upper"])

    x_flat = x.reshape(T * B, I)             # free reshape in the wrapper

    flat_inputs = [x_flat, kparams["w_ih0"], kparams["b0"], kparams["w_hh0"]]
    in_specs = [
        pl.BlockSpec((T * B, I), lambda i: (0, 0)),
        pl.BlockSpec((I, 4 * H), lambda i: (0, 0)),
        pl.BlockSpec((1, 4 * H), lambda i: (0, 0)),
        pl.BlockSpec((H, 4 * H), lambda i: (0, 0)),
    ]
    for (w_cat, b_l) in kparams["upper"]:
        flat_inputs += [w_cat, b_l]
        in_specs += [
            pl.BlockSpec(w_cat.shape, lambda i: (0, 0)),
            pl.BlockSpec(b_l.shape, lambda i: (0, 0)),
        ]
    flat_inputs += [w_reg, b_reg]
    in_specs += [
        pl.BlockSpec(w_reg.shape, lambda i: (0, 0)),
        pl.BlockSpec(b_reg.shape, lambda i: (0, 0)),
    ]

    kernel = _make_fused_kernel(T, B, I, H, O, num_layers)
    out_flat = pl.pallas_call(
        kernel,
        out_shape=jax.ShapeDtypeStruct((T * B, O), x.dtype),
        grid=(1,),
        in_specs=in_specs,
        out_specs=pl.BlockSpec((T * B, O), lambda i: (0, 0)),
        compiler_params=pltpu.CompilerParams(
            dimension_semantics=("arbitrary",)),
    )(*flat_inputs)
    return out_flat.reshape(T, B, O)


# --------------------------------------------------------------------------
# Parameter construction (PyTorch layout) + one-time kernel-layout preparation.
# --------------------------------------------------------------------------
def init_params(key, input_size, hidden_size, output_size, num_layers):
    """Deterministic PyTorch-style uniform(-1/sqrt(H), 1/sqrt(H)) init."""
    params = {"layers": []}
    bound = 1.0 / jnp.sqrt(jnp.float32(hidden_size))
    for layer in range(num_layers):
        in_dim = input_size if layer == 0 else hidden_size
        key, k1, k2, k3, k4 = jax.random.split(key, 5)
        w_ih = jax.random.uniform(k1, (4 * hidden_size, in_dim), jnp.float32, -bound, bound)
        w_hh = jax.random.uniform(k2, (4 * hidden_size, hidden_size), jnp.float32, -bound, bound)
        b_ih = jax.random.uniform(k3, (4 * hidden_size,), jnp.float32, -bound, bound)
        b_hh = jax.random.uniform(k4, (4 * hidden_size,), jnp.float32, -bound, bound)
        params["layers"].append((w_ih, w_hh, b_ih, b_hh))
    key, k5, k6 = jax.random.split(key, 3)
    params["reg_w"] = jax.random.uniform(k5, (output_size, hidden_size), jnp.float32, -bound, bound)
    params["reg_b"] = jax.random.uniform(k6, (output_size,), jnp.float32, -bound, bound)
    return params


def prepare_kernel_params(params, hidden_size):
    """One-time: transpose to lane-packed (in, 4H) gate layout, fuse ih+hh weights
    for layers >= 1, and combine biases (no per-call XLA ops beyond these)."""
    H = hidden_size
    layers = params["layers"]

    w_ih0, w_hh0, b_ih0, b_hh0 = layers[0]
    kparams = {
        "w_ih0": w_ih0.T,                              # (I, 4H), gate order [i,f,g,o]
        "b0": (b_ih0 + b_hh0).reshape(1, 4 * H),       # folded into the x projection
        "w_hh0": w_hh0.T,                              # (H, 4H)
        "upper": [],
    }
    for (w_ih, w_hh, b_ih, b_hh) in layers[1:]:
        w_cat = jnp.concatenate([w_ih.T, w_hh.T], axis=0)   # (2H, 4H) for [h_below, h_self]
        b_l = (b_ih + b_hh).reshape(1, 4 * H)
        kparams["upper"].append((w_cat, b_l))

    O = params["reg_w"].shape[0]
    kparams["reg_w"] = params["reg_w"]                 # (O, H)
    kparams["reg_b"] = params["reg_b"].reshape(1, O)   # (1, O)
    return kparams


# --------------------------------------------------------------------------
# Pure-JAX reference (sanity check).
# --------------------------------------------------------------------------
def lstm_reg_reference(params, x):
    h_seq = x
    for (w_ih, w_hh, b_ih, b_hh) in params["layers"]:
        H = w_hh.shape[1]
        B = h_seq.shape[1]

        def step(carry, x_t):
            h, c = carry
            gates = x_t @ w_ih.T + b_ih + h @ w_hh.T + b_hh
            i = jax.nn.sigmoid(gates[:, 0 * H:1 * H])
            f = jax.nn.sigmoid(gates[:, 1 * H:2 * H])
            g = jnp.tanh(gates[:, 2 * H:3 * H])
            o = jax.nn.sigmoid(gates[:, 3 * H:4 * H])
            c_new = f * c + i * g
            h_new = o * jnp.tanh(c_new)
            return (h_new, c_new), h_new

        init = (jnp.zeros((B, H), jnp.float32), jnp.zeros((B, H), jnp.float32))
        _, h_seq = lax.scan(step, init, h_seq)
    return h_seq @ params["reg_w"].T + params["reg_b"]


if __name__ == "__main__":
    input_size, hidden_size, output_size, num_layers = 8, 32, 1, 2
    T, B = 8, 8   # (seq_len, batch) -- batch_first=False; B=8 fills the f32 sublane tile

    key = jax.random.PRNGKey(0)
    kx, kp = jax.random.split(key)
    x = jax.random.normal(kx, (T, B, input_size), jnp.float32)
    params = init_params(kp, input_size, hidden_size, output_size, num_layers)
    kparams = prepare_kernel_params(params, hidden_size)

    out = jax.block_until_ready(lstm_reg_forward(kparams, x))
    ref = jax.block_until_ready(lstm_reg_reference(params, x))

    assert out.shape == (T, B, output_size)
    assert jnp.allclose(out, ref, atol=1e-4, rtol=1e-4), "mismatch vs reference"

    print("KERNEL_OK")
</pallas_src>

<mosaic_0001>
module attributes {stable_mosaic.version = 11 : i64} {
  func.func @kernel(%arg0: i32, %arg1: memref<64x8xf32, #tpu.memory_space<vmem>>, %arg2: memref<8x128xf32, #tpu.memory_space<vmem>>, %arg3: memref<1x128xf32, #tpu.memory_space<vmem>>, %arg4: memref<32x128xf32, #tpu.memory_space<vmem>>, %arg5: memref<64x128xf32, #tpu.memory_space<vmem>>, %arg6: memref<1x128xf32, #tpu.memory_space<vmem>>, %arg7: memref<1x32xf32, #tpu.memory_space<vmem>>, %arg8: memref<1x1xf32, #tpu.memory_space<vmem>>, %arg9: memref<64x1xf32, #tpu.memory_space<vmem>>) attributes {dimension_semantics = [#tpu.dimension_semantics<arbitrary>], iteration_bounds = array<i64: 1>, scalar_prefetch = 0 : i64, scratch_operands = 0 : i64, tpu.core_type = #tpu.core_type<tc>, window_params = [{pipeline_mode = #tpu.pipeline_mode<synchronous>, transform_indices = @transform_0, window_bounds = array<i64: 64, 8>}, {pipeline_mode = #tpu.pipeline_mode<synchronous>, transform_indices = @transform_1, window_bounds = array<i64: 8, 128>}, {pipeline_mode = #tpu.pipeline_mode<synchronous>, transform_indices = @transform_2, window_bounds = array<i64: 1, 128>}, {pipeline_mode = #tpu.pipeline_mode<synchronous>, transform_indices = @transform_3, window_bounds = array<i64: 32, 128>}, {pipeline_mode = #tpu.pipeline_mode<synchronous>, transform_indices = @transform_4, window_bounds = array<i64: 64, 128>}, {pipeline_mode = #tpu.pipeline_mode<synchronous>, transform_indices = @transform_5, window_bounds = array<i64: 1, 128>}, {pipeline_mode = #tpu.pipeline_mode<synchronous>, transform_indices = @transform_6, window_bounds = array<i64: 1, 32>}, {pipeline_mode = #tpu.pipeline_mode<synchronous>, transform_indices = @transform_7, window_bounds = array<i64: 1, 1>}, {pipeline_mode = #tpu.pipeline_mode<synchronous>, transform_indices = @transform_8, window_bounds = array<i64: 64, 1>}]} {
    %c0 = arith.constant 0 : index
    %c0_0 = arith.constant 0 : index
    %0 = vector.load %arg4[%c0, %c0_0] : memref<32x128xf32, #tpu.memory_space<vmem>>, vector<32x128xf32>
    %c0_1 = arith.constant 0 : index
    %c0_2 = arith.constant 0 : index
    %1 = vector.load %arg5[%c0_1, %c0_2] : memref<64x128xf32, #tpu.memory_space<vmem>>, vector<64x128xf32>
    %c0_3 = arith.constant 0 : index
    %c0_4 = arith.constant 0 : index
    %2 = vector.load %arg6[%c0_3, %c0_4] : memref<1x128xf32, #tpu.memory_space<vmem>>, vector<1x128xf32>
    %3 = vector.shape_cast %2 : vector<1x128xf32> to vector<1x128xf32>
    %4 = vector.broadcast %3 : vector<1x128xf32> to vector<8x128xf32>
    %c0_5 = arith.constant 0 : index
    %c0_6 = arith.constant 0 : index
    %5 = vector.load %arg7[%c0_5, %c0_6] : memref<1x32xf32, #tpu.memory_space<vmem>>, vector<1x32xf32>
    %c0_7 = arith.constant 0 : index
    %c0_8 = arith.constant 0 : index
    %6 = vector.load %arg8[%c0_7, %c0_8] : memref<1x1xf32, #tpu.memory_space<vmem>>, vector<1x1xf32>
    %c0_9 = arith.constant 0 : index
    %c0_10 = arith.constant 0 : index
    %7 = vector.load %arg1[%c0_9, %c0_10] : memref<64x8xf32, #tpu.memory_space<vmem>>, vector<64x8xf32>
    %c0_11 = arith.constant 0 : index
    %c0_12 = arith.constant 0 : index
    %8 = vector.load %arg2[%c0_11, %c0_12] : memref<8x128xf32, #tpu.memory_space<vmem>>, vector<8x128xf32>
    %cst = arith.constant dense<0.000000e+00> : vector<64x128xf32>
    %9 = tpu.matmul %7, %8, %cst {dimension_numbers = #tpu.dot_dimension_numbers<[1], [0], [0], [1], [0, 0, 1, 1], [], []>} : vector<64x8xf32>, vector<8x128xf32>, vector<64x128xf32> -> vector<64x128xf32>
    %c0_13 = arith.constant 0 : index
    %c0_14 = arith.constant 0 : index
    %10 = vector.load %arg3[%c0_13, %c0_14] : memref<1x128xf32, #tpu.memory_space<vmem>>, vector<1x128xf32>
    %11 = vector.broadcast %10 : vector<1x128xf32> to vector<64x128xf32>
    %12 = arith.addf %9, %11 : vector<64x128xf32>
    %13 = tpu.iota {dimensions = array<i32: 1>} : vector<8x128xi32>
    %c64_i32 = arith.constant 64 : i32
    %14 = vector.broadcast %c64_i32 : i32 to vector<8x128xi32>
    %15 = arith.cmpi sge, %13, %14 : vector<8x128xi32>
    %c96_i32 = arith.constant 96 : i32
    %16 = vector.broadcast %c96_i32 : i32 to vector<8x128xi32>
    %17 = arith.cmpi slt, %13, %16 : vector<8x128xi32>
    %18 = arith.andi %15, %17 : vector<8x128xi1>
    %cst_15 = arith.constant 0.000000e+00 : f32
    %19 = vector.broadcast %cst_15 : f32 to vector<8x32xf32>
    %cst_16 = arith.constant 0.000000e+00 : f32
    %20 = vector.broadcast %cst_16 : f32 to vector<8x32xf32>
    %cst_17 = arith.constant 0.000000e+00 : f32
    %21 = vector.broadcast %cst_17 : f32 to vector<8x32xf32>
    %cst_18 = arith.constant 0.000000e+00 : f32
    %22 = vector.broadcast %cst_18 : f32 to vector<8x32xf32>
    %23 = vector.extract_strided_slice %12 {offsets = [0, 0], sizes = [8, 128], strides = [1, 1]} : vector<64x128xf32> to vector<8x128xf32>
    %cst_19 = arith.constant dense<0.000000e+00> : vector<8x128xf32>
    %24 = tpu.matmul %19, %0, %cst_19 {dimension_numbers = #tpu.dot_dimension_numbers<[1], [0], [0], [1], [0, 0, 1, 1], [], []>} : vector<8x32xf32>, vector<32x128xf32>, vector<8x128xf32> -> vector<8x128xf32>
    %25 = arith.addf %23, %24 : vector<8x128xf32>
    %26 = math.tanh %25 : vector<8x128xf32>
    %27 = arith.negf %25 : vector<8x128xf32>
    %28 = math.exp %27 : vector<8x128xf32>
    %cst_20 = arith.constant 1.000000e+00 : f32
    %29 = vector.broadcast %cst_20 : f32 to vector<8x128xf32>
    %30 = arith.addf %29, %28 : vector<8x128xf32>
    %31 = arith.divf %29, %30 : vector<8x128xf32>
    %32 = arith.select %18, %26, %31 : vector<8x128xi1>, vector<8x128xf32>
    %33 = vector.extract_strided_slice %32 {offsets = [0, 0], sizes = [8, 32], strides = [1, 1]} : vector<8x128xf32> to vector<8x32xf32>
    %34 = vector.extract_strided_slice %32 {offsets = [0, 32], sizes = [8, 32], strides = [1, 1]} : vector<8x128xf32> to vector<8x32xf32>
    %35 = vector.extract_strided_slice %32 {offsets = [0, 64], sizes = [8, 32], strides = [1, 1]} : vector<8x128xf32> to vector<8x32xf32>
    %36 = vector.extract_strided_slice %32 {offsets = [0, 96], sizes = [8, 32], strides = [1, 1]} : vector<8x128xf32> to vector<8x32xf32>
    %37 = arith.mulf %34, %21 : vector<8x32xf32>
    %38 = arith.mulf %33, %35 : vector<8x32xf32>
    %39 = arith.addf %37, %38 : vector<8x32xf32>
    %40 = math.tanh %39 : vector<8x32xf32>
    %41 = arith.mulf %36, %40 : vector<8x32xf32>
    %42 = tpu.concatenate %41, %20 in 1 : vector<8x32xf32>, vector<8x32xf32> -> vector<8x64xf32>
    %cst_21 = arith.constant dense<0.000000e+00> : vector<8x128xf32>
    %43 = tpu.matmul %42, %1, %cst_21 {dimension_numbers = #tpu.dot_dimension_numbers<[1], [0], [0], [1], [0, 0, 1, 1], [], []>} : vector<8x64xf32>, vector<64x128xf32>, vector<8x128xf32> -> vector<8x128xf32>
    %44 = arith.addf %43, %4 : vector<8x128xf32>
    %45 = math.tanh %44 : vector<8x128xf32>
    %46 = arith.negf %44 : vector<8x128xf32>
    %47 = math.exp %46 : vector<8x128xf32>
    %cst_22 = arith.constant 1.000000e+00 : f32
    %48 = vector.broadcast %cst_22 : f32 to vector<8x128xf32>
    %49 = arith.addf %48, %47 : vector<8x128xf32>
    %50 = arith.divf %48, %49 : vector<8x128xf32>
    %51 = arith.select %18, %45, %50 : vector<8x128xi1>, vector<8x128xf32>
    %52 = vector.extract_strided_slice %51 {offsets = [0, 0], sizes = [8, 32], strides = [1, 1]} : vector<8x128xf32> to vector<8x32xf32>
    %53 = vector.extract_strided_slice %51 {offsets = [0, 32], sizes = [8, 32], strides = [1, 1]} : vector<8x128xf32> to vector<8x32xf32>
    %54 = vector.extract_strided_slice %51 {offsets = [0, 64], sizes = [8, 32], strides = [1, 1]} : vector<8x128xf32> to vector<8x32xf32>
    %55 = vector.extract_strided_slice %51 {offsets = [0, 96], sizes = [8, 32], strides = [1, 1]} : vector<8x128xf32> to vector<8x32xf32>
    %56 = arith.mulf %53, %22 : vector<8x32xf32>
    %57 = arith.mulf %52, %54 : vector<8x32xf32>
    %58 = arith.addf %56, %57 : vector<8x32xf32>
    %59 = math.tanh %58 : vector<8x32xf32>
    %60 = arith.mulf %55, %59 : vector<8x32xf32>
    %61 = vector.extract_strided_slice %12 {offsets = [8, 0], sizes = [8, 128], strides = [1, 1]} : vector<64x128xf32> to vector<8x128xf32>
    %cst_23 = arith.constant dense<0.000000e+00> : vector<8x128xf32>
    %62 = tpu.matmul %41, %0, %cst_23 {dimension_numbers = #tpu.dot_dimension_numbers<[1], [0], [0], [1], [0, 0, 1, 1], [], []>} : vector<8x32xf32>, vector<32x128xf32>, vector<8x128xf32> -> vector<8x128xf32>
    %63 = arith.addf %61, %62 : vector<8x128xf32>
    %64 = math.tanh %63 : vector<8x128xf32>
    %65 = arith.negf %63 : vector<8x128xf32>
    %66 = math.exp %65 : vector<8x128xf32>
    %cst_24 = arith.constant 1.000000e+00 : f32
    %67 = vector.broadcast %cst_24 : f32 to vector<8x128xf32>
    %68 = arith.addf %67, %66 : vector<8x128xf32>
    %69 = arith.divf %67, %68 : vector<8x128xf32>
    %70 = arith.select %18, %64, %69 : vector<8x128xi1>, vector<8x128xf32>
    %71 = vector.extract_strided_slice %70 {offsets = [0, 0], sizes = [8, 32], strides = [1, 1]} : vector<8x128xf32> to vector<8x32xf32>
    %72 = vector.extract_strided_slice %70 {offsets = [0, 32], sizes = [8, 32], strides = [1, 1]} : vector<8x128xf32> to vector<8x32xf32>
    %73 = vector.extract_strided_slice %70 {offsets = [0, 64], sizes = [8, 32], strides = [1, 1]} : vector<8x128xf32> to vector<8x32xf32>
    %74 = vector.extract_strided_slice %70 {offsets = [0, 96], sizes = [8, 32], strides = [1, 1]} : vector<8x128xf32> to vector<8x32xf32>
    %75 = arith.mulf %72, %39 : vector<8x32xf32>
    %76 = arith.mulf %71, %73 : vector<8x32xf32>
    %77 = arith.addf %75, %76 : vector<8x32xf32>
    %78 = math.tanh %77 : vector<8x32xf32>
    %79 = arith.mulf %74, %78 : vector<8x32xf32>
    %80 = tpu.concatenate %79, %60 in 1 : vector<8x32xf32>, vector<8x32xf32> -> vector<8x64xf32>
    %cst_25 = arith.constant dense<0.000000e+00> : vector<8x128xf32>
    %81 = tpu.matmul %80, %1, %cst_25 {dimension_numbers = #tpu.dot_dimension_numbers<[1], [0], [0], [1], [0, 0, 1, 1], [], []>} : vector<8x64xf32>, vector<64x128xf32>, vector<8x128xf32> -> vector<8x128xf32>
    %82 = arith.addf %81, %4 : vector<8x128xf32>
    %83 = math.tanh %82 : vector<8x128xf32>
    %84 = arith.negf %82 : vector<8x128xf32>
    %85 = math.exp %84 : vector<8x128xf32>
    %cst_26 = arith.constant 1.000000e+00 : f32
    %86 = vector.broadcast %cst_26 : f32 to vector<8x128xf32>
    %87 = arith.addf %86, %85 : vector<8x128xf32>
    %88 = arith.divf %86, %87 : vector<8x128xf32>
    %89 = arith.select %18, %83, %88 : vector<8x128xi1>, vector<8x128xf32>
    %90 = vector.extract_strided_slice %89 {offsets = [0, 0], sizes = [8, 32], strides = [1, 1]} : vector<8x128xf32> to vector<8x32xf32>
    %91 = vector.extract_strided_slice %89 {offsets = [0, 32], sizes = [8, 32], strides = [1, 1]} : vector<8x128xf32> to vector<8x32xf32>
    %92 = vector.extract_strided_slice %89 {offsets = [0, 64], sizes = [8, 32], strides = [1, 1]} : vector<8x128xf32> to vector<8x32xf32>
    %93 = vector.extract_strided_slice %89 {offsets = [0, 96], sizes = [8, 32], strides = [1, 1]} : vector<8x128xf32> to vector<8x32xf32>
    %94 = arith.mulf %91, %58 : vector<8x32xf32>
    %95 = arith.mulf %90, %92 : vector<8x32xf32>
    %96 = arith.addf %94, %95 : vector<8x32xf32>
    %97 = math.tanh %96 : vector<8x32xf32>
    %98 = arith.mulf %93, %97 : vector<8x32xf32>
    %99 = vector.extract_strided_slice %12 {offsets = [16, 0], sizes = [8, 128], strides = [1, 1]} : vector<64x128xf32> to vector<8x128xf32>
    %cst_27 = arith.constant dense<0.000000e+00> : vector<8x128xf32>
    %100 = tpu.matmul %79, %0, %cst_27 {dimension_numbers = #tpu.dot_dimension_numbers<[1], [0], [0], [1], [0, 0, 1, 1], [], []>} : vector<8x32xf32>, vector<32x128xf32>, vector<8x128xf32> -> vector<8x128xf32>
    %101 = arith.addf %99, %100 : vector<8x128xf32>
    %102 = math.tanh %101 : vector<8x128xf32>
    %103 = arith.negf %101 : vector<8x128xf32>
    %104 = math.exp %103 : vector<8x128xf32>
    %cst_28 = arith.constant 1.000000e+00 : f32
    %105 = vector.broadcast %cst_28 : f32 to vector<8x128xf32>
    %106 = arith.addf %105, %104 : vector<8x128xf32>
    %107 = arith.divf %105, %106 : vector<8x128xf32>
    %108 = arith.select %18, %102, %107 : vector<8x128xi1>, vector<8x128xf32>
    %109 = vector.extract_strided_slice %108 {offsets = [0, 0], sizes = [8, 32], strides = [1, 1]} : vector<8x128xf32> to vector<8x32xf32>
    %110 = vector.extract_strided_slice %108 {offsets = [0, 32], sizes = [8, 32], strides = [1, 1]} : vector<8x128xf32> to vector<8x32xf32>
    %111 = vector.extract_strided_slice %108 {offsets = [0, 64], sizes = [8, 32], strides = [1, 1]} : vector<8x128xf32> to vector<8x32xf32>
    %112 = vector.extract_strided_slice %108 {offsets = [0, 96], sizes = [8, 32], strides = [1, 1]} : vector<8x128xf32> to vector<8x32xf32>
    %113 = arith.mulf %110, %77 : vector<8x32xf32>
    %114 = arith.mulf %109, %111 : vector<8x32xf32>
    %115 = arith.addf %113, %114 : vector<8x32xf32>
    %116 = math.tanh %115 : vector<8x32xf32>
    %117 = arith.mulf %112, %116 : vector<8x32xf32>
    %118 = tpu.concatenate %117, %98 in 1 : vector<8x32xf32>, vector<8x32xf32> -> vector<8x64xf32>
    %cst_29 = arith.constant dense<0.000000e+00> : vector<8x128xf32>
    %119 = tpu.matmul %118, %1, %cst_29 {dimension_numbers = #tpu.dot_dimension_numbers<[1], [0], [0], [1], [0, 0, 1, 1], [], []>} : vector<8x64xf32>, vector<64x128xf32>, vector<8x128xf32> -> vector<8x128xf32>
    %120 = arith.addf %119, %4 : vector<8x128xf32>
    %121 = math.tanh %120 : vector<8x128xf32>
    %122 = arith.negf %120 : vector<8x128xf32>
    %123 = math.exp %122 : vector<8x128xf32>
    %cst_30 = arith.constant 1.000000e+00 : f32
    %124 = vector.broadcast %cst_30 : f32 to vector<8x128xf32>
    %125 = arith.addf %124, %123 : vector<8x128xf32>
    %126 = arith.divf %124, %125 : vector<8x128xf32>
    %127 = arith.select %18, %121, %126 : vector<8x128xi1>, vector<8x128xf32>
    %128 = vector.extract_strided_slice %127 {offsets = [0, 0], sizes = [8, 32], strides = [1, 1]} : vector<8x128xf32> to vector<8x32xf32>
    %129 = vector.extract_strided_slice %127 {offsets = [0, 32], sizes = [8, 32], strides = [1, 1]} : vector<8x128xf32> to vector<8x32xf32>
    %130 = vector.extract_strided_slice %127 {offsets = [0, 64], sizes = [8, 32], strides = [1, 1]} : vector<8x128xf32> to vector<8x32xf32>
    %131 = vector.extract_strided_slice %127 {offsets = [0, 96], sizes = [8, 32], strides = [1, 1]} : vector<8x128xf32> to vector<8x32xf32>
    %132 = arith.mulf %129, %96 : vector<8x32xf32>
    %133 = arith.mulf %128, %130 : vector<8x32xf32>
    %134 = arith.addf %132, %133 : vector<8x32xf32>
    %135 = math.tanh %134 : vector<8x32xf32>
    %136 = arith.mulf %131, %135 : vector<8x32xf32>
    %137 = vector.extract_strided_slice %12 {offsets = [24, 0], sizes = [8, 128], strides = [1, 1]} : vector<64x128xf32> to vector<8x128xf32>
    %cst_31 = arith.constant dense<0.000000e+00> : vector<8x128xf32>
    %138 = tpu.matmul %117, %0, %cst_31 {dimension_numbers = #tpu.dot_dimension_numbers<[1], [0], [0], [1], [0, 0, 1, 1], [], []>} : vector<8x32xf32>, vector<32x128xf32>, vector<8x128xf32> -> vector<8x128xf32>
    %139 = arith.addf %137, %138 : vector<8x128xf32>
    %140 = math.tanh %139 : vector<8x128xf32>
    %141 = arith.negf %139 : vector<8x128xf32>
    %142 = math.exp %141 : vector<8x128xf32>
    %cst_32 = arith.constant 1.000000e+00 : f32
    %143 = vector.broadcast %cst_32 : f32 to vector<8x128xf32>
    %144 = arith.addf %143, %142 : vector<8x128xf32>
    %145 = arith.divf %143, %144 : vector<8x128xf32>
    %146 = arith.select %18, %140, %145 : vector<8x128xi1>, vector<8x128xf32>
    %147 = vector.extract_strided_slice %146 {offsets = [0, 0], sizes = [8, 32], strides = [1, 1]} : vector<8x128xf32> to vector<8x32xf32>
    %148 = vector.extract_strided_slice %146 {offsets = [0, 32], sizes = [8, 32], strides = [1, 1]} : vector<8x128xf32> to vector<8x32xf32>
    %149 = vector.extract_strided_slice %146 {offsets = [0, 64], sizes = [8, 32], strides = [1, 1]} : vector<8x128xf32> to vector<8x32xf32>
    %150 = vector.extract_strided_slice %146 {offsets = [0, 96], sizes = [8, 32], strides = [1, 1]} : vector<8x128xf32> to vector<8x32xf32>
    %151 = arith.mulf %148, %115 : vector<8x32xf32>
    %152 = arith.mulf %147, %149 : vector<8x32xf32>
    %153 = arith.addf %151, %152 : vector<8x32xf32>
    %154 = math.tanh %153 : vector<8x32xf32>
    %155 = arith.mulf %150, %154 : vector<8x32xf32>
    %156 = tpu.concatenate %155, %136 in 1 : vector<8x32xf32>, vector<8x32xf32> -> vector<8x64xf32>
    %cst_33 = arith.constant dense<0.000000e+00> : vector<8x128xf32>
    %157 = tpu.matmul %156, %1, %cst_33 {dimension_numbers = #tpu.dot_dimension_numbers<[1], [0], [0], [1], [0, 0, 1, 1], [], []>} : vector<8x64xf32>, vector<64x128xf32>, vector<8x128xf32> -> vector<8x128xf32>
    %158 = arith.addf %157, %4 : vector<8x128xf32>
    %159 = math.tanh %158 : vector<8x128xf32>
    %160 = arith.negf %158 : vector<8x128xf32>
    %161 = math.exp %160 : vector<8x128xf32>
    %cst_34 = arith.constant 1.000000e+00 : f32
    %162 = vector.broadcast %cst_34 : f32 to vector<8x128xf32>
    %163 = arith.addf %162, %161 : vector<8x128xf32>
    %164 = arith.divf %162, %163 : vector<8x128xf32>
    %165 = arith.select %18, %159, %164 : vector<8x128xi1>, vector<8x128xf32>
    %166 = vector.extract_strided_slice %165 {offsets = [0, 0], sizes = [8, 32], strides = [1, 1]} : vector<8x128xf32> to vector<8x32xf32>
    %167 = vector.extract_strided_slice %165 {offsets = [0, 32], sizes = [8, 32], strides = [1, 1]} : vector<8x128xf32> to vector<8x32xf32>
    %168 = vector.extract_strided_slice %165 {offsets = [0, 64], sizes = [8, 32], strides = [1, 1]} : vector<8x128xf32> to vector<8x32xf32>
    %169 = vector.extract_strided_slice %165 {offsets = [0, 96], sizes = [8, 32], strides = [1, 1]} : vector<8x128xf32> to vector<8x32xf32>
    %170 = arith.mulf %167, %134 : vector<8x32xf32>
    %171 = arith.mulf %166, %168 : vector<8x32xf32>
    %172 = arith.addf %170, %171 : vector<8x32xf32>
    %173 = math.tanh %172 : vector<8x32xf32>
    %174 = arith.mulf %169, %173 : vector<8x32xf32>
    %175 = vector.extract_strided_slice %12 {offsets = [32, 0], sizes = [8, 128], strides = [1, 1]} : vector<64x128xf32> to vector<8x128xf32>
    %cst_35 = arith.constant dense<0.000000e+00> : vector<8x128xf32>
    %176 = tpu.matmul %155, %0, %cst_35 {dimension_numbers = #tpu.dot_dimension_numbers<[1], [0], [0], [1], [0, 0, 1, 1], [], []>} : vector<8x32xf32>, vector<32x128xf32>, vector<8x128xf32> -> vector<8x128xf32>
    %177 = arith.addf %175, %176 : vector<8x128xf32>
    %178 = math.tanh %177 : vector<8x128xf32>
    %179 = arith.negf %177 : vector<8x128xf32>
    %180 = math.exp %179 : vector<8x128xf32>
    %cst_36 = arith.constant 1.000000e+00 : f32
    %181 = vector.broadcast %cst_36 : f32 to vector<8x128xf32>
    %182 = arith.addf %181, %180 : vector<8x128xf32>
    %183 = arith.divf %181, %182 : vector<8x128xf32>
    %184 = arith.select %18, %178, %183 : vector<8x128xi1>, vector<8x128xf32>
    %185 = vector.extract_strided_slice %184 {offsets = [0, 0], sizes = [8, 32], strides = [1, 1]} : vector<8x128xf32> to vector<8x32xf32>
    %186 = vector.extract_strided_slice %184 {offsets = [0, 32], sizes = [8, 32], strides = [1, 1]} : vector<8x128xf32> to vector<8x32xf32>
    %187 = vector.extract_strided_slice %184 {offsets = [0, 64], sizes = [8, 32], strides = [1, 1]} : vector<8x128xf32> to vector<8x32xf32>
    %188 = vector.extract_strided_slice %184 {offsets = [0, 96], sizes = [8, 32], strides = [1, 1]} : vector<8x128xf32> to vector<8x32xf32>
    %189 = arith.mulf %186, %153 : vector<8x32xf32>
    %190 = arith.mulf %185, %187 : vector<8x32xf32>
    %191 = arith.addf %189, %190 : vector<8x32xf32>
    %192 = math.tanh %191 : vector<8x32xf32>
    %193 = arith.mulf %188, %192 : vector<8x32xf32>
    %194 = tpu.concatenate %193, %174 in 1 : vector<8x32xf32>, vector<8x32xf32> -> vector<8x64xf32>
    %cst_37 = arith.constant dense<0.000000e+00> : vector<8x128xf32>
    %195 = tpu.matmul %194, %1, %cst_37 {dimension_numbers = #tpu.dot_dimension_numbers<[1], [0], [0], [1], [0, 0, 1, 1], [], []>} : vector<8x64xf32>, vector<64x128xf32>, vector<8x128xf32> -> vector<8x128xf32>
    %196 = arith.addf %195, %4 : vector<8x128xf32>
    %197 = math.tanh %196 : vector<8x128xf32>
    %198 = arith.negf %196 : vector<8x128xf32>
    %199 = math.exp %198 : vector<8x128xf32>
    %cst_38 = arith.constant 1.000000e+00 : f32
    %200 = vector.broadcast %cst_38 : f32 to vector<8x128xf32>
    %201 = arith.addf %200, %199 : vector<8x128xf32>
    %202 = arith.divf %200, %201 : vector<8x128xf32>
    %203 = arith.select %18, %197, %202 : vector<8x128xi1>, vector<8x128xf32>
    %204 = vector.extract_strided_slice %203 {offsets = [0, 0], sizes = [8, 32], strides = [1, 1]} : vector<8x128xf32> to vector<8x32xf32>
    %205 = vector.extract_strided_slice %203 {offsets = [0, 32], sizes = [8, 32], strides = [1, 1]} : vector<8x128xf32> to vector<8x32xf32>
    %206 = vector.extract_strided_slice %203 {offsets = [0, 64], sizes = [8, 32], strides = [1, 1]} : vector<8x128xf32> to vector<8x32xf32>
    %207 = vector.extract_strided_slice %203 {offsets = [0, 96], sizes = [8, 32], strides = [1, 1]} : vector<8x128xf32> to vector<8x32xf32>
    %208 = arith.mulf %205, %172 : vector<8x32xf32>
    %209 = arith.mulf %204, %206 : vector<8x32xf32>
    %210 = arith.addf %208, %209 : vector<8x32xf32>
    %211 = math.tanh %210 : vector<8x32xf32>
    %212 = arith.mulf %207, %211 : vector<8x32xf32>
    %213 = vector.extract_strided_slice %12 {offsets = [40, 0], sizes = [8, 128], strides = [1, 1]} : vector<64x128xf32> to vector<8x128xf32>
    %cst_39 = arith.constant dense<0.000000e+00> : vector<8x128xf32>
    %214 = tpu.matmul %193, %0, %cst_39 {dimension_numbers = #tpu.dot_dimension_numbers<[1], [0], [0], [1], [0, 0, 1, 1], [], []>} : vector<8x32xf32>, vector<32x128xf32>, vector<8x128xf32> -> vector<8x128xf32>
    %215 = arith.addf %213, %214 : vector<8x128xf32>
    %216 = math.tanh %215 : vector<8x128xf32>
    %217 = arith.negf %215 : vector<8x128xf32>
    %218 = math.exp %217 : vector<8x128xf32>
    %cst_40 = arith.constant 1.000000e+00 : f32
    %219 = vector.broadcast %cst_40 : f32 to vector<8x128xf32>
    %220 = arith.addf %219, %218 : vector<8x128xf32>
    %221 = arith.divf %219, %220 : vector<8x128xf32>
    %222 = arith.select %18, %216, %221 : vector<8x128xi1>, vector<8x128xf32>
    %223 = vector.extract_strided_slice %222 {offsets = [0, 0], sizes = [8, 32], strides = [1, 1]} : vector<8x128xf32> to vector<8x32xf32>
    %224 = vector.extract_strided_slice %222 {offsets = [0, 32], sizes = [8, 32], strides = [1, 1]} : vector<8x128xf32> to vector<8x32xf32>
    %225 = vector.extract_strided_slice %222 {offsets = [0, 64], sizes = [8, 32], strides = [1, 1]} : vector<8x128xf32> to vector<8x32xf32>
    %226 = vector.extract_strided_slice %222 {offsets = [0, 96], sizes = [8, 32], strides = [1, 1]} : vector<8x128xf32> to vector<8x32xf32>
    %227 = arith.mulf %224, %191 : vector<8x32xf32>
    %228 = arith.mulf %223, %225 : vector<8x32xf32>
    %229 = arith.addf %227, %228 : vector<8x32xf32>
    %230 = math.tanh %229 : vector<8x32xf32>
    %231 = arith.mulf %226, %230 : vector<8x32xf32>
    %232 = tpu.concatenate %231, %212 in 1 : vector<8x32xf32>, vector<8x32xf32> -> vector<8x64xf32>
    %cst_41 = arith.constant dense<0.000000e+00> : vector<8x128xf32>
    %233 = tpu.matmul %232, %1, %cst_41 {dimension_numbers = #tpu.dot_dimension_numbers<[1], [0], [0], [1], [0, 0, 1, 1], [], []>} : vector<8x64xf32>, vector<64x128xf32>, vector<8x128xf32> -> vector<8x128xf32>
    %234 = arith.addf %233, %4 : vector<8x128xf32>
    %235 = math.tanh %234 : vector<8x128xf32>
    %236 = arith.negf %234 : vector<8x128xf32>
    %237 = math.exp %236 : vector<8x128xf32>
    %cst_42 = arith.constant 1.000000e+00 : f32
    %238 = vector.broadcast %cst_42 : f32 to vector<8x128xf32>
    %239 = arith.addf %238, %237 : vector<8x128xf32>
    %240 = arith.divf %238, %239 : vector<8x128xf32>
    %241 = arith.select %18, %235, %240 : vector<8x128xi1>, vector<8x128xf32>
    %242 = vector.extract_strided_slice %241 {offsets = [0, 0], sizes = [8, 32], strides = [1, 1]} : vector<8x128xf32> to vector<8x32xf32>
    %243 = vector.extract_strided_slice %241 {offsets = [0, 32], sizes = [8, 32], strides = [1, 1]} : vector<8x128xf32> to vector<8x32xf32>
    %244 = vector.extract_strided_slice %241 {offsets = [0, 64], sizes = [8, 32], strides = [1, 1]} : vector<8x128xf32> to vector<8x32xf32>
    %245 = vector.extract_strided_slice %241 {offsets = [0, 96], sizes = [8, 32], strides = [1, 1]} : vector<8x128xf32> to vector<8x32xf32>
    %246 = arith.mulf %243, %210 : vector<8x32xf32>
    %247 = arith.mulf %242, %244 : vector<8x32xf32>
    %248 = arith.addf %246, %247 : vector<8x32xf32>
    %249 = math.tanh %248 : vector<8x32xf32>
    %250 = arith.mulf %245, %249 : vector<8x32xf32>
    %251 = vector.extract_strided_slice %12 {offsets = [48, 0], sizes = [8, 128], strides = [1, 1]} : vector<64x128xf32> to vector<8x128xf32>
    %cst_43 = arith.constant dense<0.000000e+00> : vector<8x128xf32>
    %252 = tpu.matmul %231, %0, %cst_43 {dimension_numbers = #tpu.dot_dimension_numbers<[1], [0], [0], [1], [0, 0, 1, 1], [], []>} : vector<8x32xf32>, vector<32x128xf32>, vector<8x128xf32> -> vector<8x128xf32>
    %253 = arith.addf %251, %252 : vector<8x128xf32>
    %254 = math.tanh %253 : vector<8x128xf32>
    %255 = arith.negf %253 : vector<8x128xf32>
    %256 = math.exp %255 : vector<8x128xf32>
    %cst_44 = arith.constant 1.000000e+00 : f32
    %257 = vector.broadcast %cst_44 : f32 to vector<8x128xf32>
    %258 = arith.addf %257, %256 : vector<8x128xf32>
    %259 = arith.divf %257, %258 : vector<8x128xf32>
    %260 = arith.select %18, %254, %259 : vector<8x128xi1>, vector<8x128xf32>
    %261 = vector.extract_strided_slice %260 {offsets = [0, 0], sizes = [8, 32], strides = [1, 1]} : vector<8x128xf32> to vector<8x32xf32>
    %262 = vector.extract_strided_slice %260 {offsets = [0, 32], sizes = [8, 32], strides = [1, 1]} : vector<8x128xf32> to vector<8x32xf32>
    %263 = vector.extract_strided_slice %260 {offsets = [0, 64], sizes = [8, 32], strides = [1, 1]} : vector<8x128xf32> to vector<8x32xf32>
    %264 = vector.extract_strided_slice %260 {offsets = [0, 96], sizes = [8, 32], strides = [1, 1]} : vector<8x128xf32> to vector<8x32xf32>
    %265 = arith.mulf %262, %229 : vector<8x32xf32>
    %266 = arith.mulf %261, %263 : vector<8x32xf32>
    %267 = arith.addf %265, %266 : vector<8x32xf32>
    %268 = math.tanh %267 : vector<8x32xf32>
    %269 = arith.mulf %264, %268 : vector<8x32xf32>
    %270 = tpu.concatenate %269, %250 in 1 : vector<8x32xf32>, vector<8x32xf32> -> vector<8x64xf32>
    %cst_45 = arith.constant dense<0.000000e+00> : vector<8x128xf32>
    %271 = tpu.matmul %270, %1, %cst_45 {dimension_numbers = #tpu.dot_dimension_numbers<[1], [0], [0], [1], [0, 0, 1, 1], [], []>} : vector<8x64xf32>, vector<64x128xf32>, vector<8x128xf32> -> vector<8x128xf32>
    %272 = arith.addf %271, %4 : vector<8x128xf32>
    %273 = math.tanh %272 : vector<8x128xf32>
    %274 = arith.negf %272 : vector<8x128xf32>
    %275 = math.exp %274 : vector<8x128xf32>
    %cst_46 = arith.constant 1.000000e+00 : f32
    %276 = vector.broadcast %cst_46 : f32 to vector<8x128xf32>
    %277 = arith.addf %276, %275 : vector<8x128xf32>
    %278 = arith.divf %276, %277 : vector<8x128xf32>
    %279 = arith.select %18, %273, %278 : vector<8x128xi1>, vector<8x128xf32>
    %280 = vector.extract_strided_slice %279 {offsets = [0, 0], sizes = [8, 32], strides = [1, 1]} : vector<8x128xf32> to vector<8x32xf32>
    %281 = vector.extract_strided_slice %279 {offsets = [0, 32], sizes = [8, 32], strides = [1, 1]} : vector<8x128xf32> to vector<8x32xf32>
    %282 = vector.extract_strided_slice %279 {offsets = [0, 64], sizes = [8, 32], strides = [1, 1]} : vector<8x128xf32> to vector<8x32xf32>
    %283 = vector.extract_strided_slice %279 {offsets = [0, 96], sizes = [8, 32], strides = [1, 1]} : vector<8x128xf32> to vector<8x32xf32>
    %284 = arith.mulf %281, %248 : vector<8x32xf32>
    %285 = arith.mulf %280, %282 : vector<8x32xf32>
    %286 = arith.addf %284, %285 : vector<8x32xf32>
    %287 = math.tanh %286 : vector<8x32xf32>
    %288 = arith.mulf %283, %287 : vector<8x32xf32>
    %289 = vector.extract_strided_slice %12 {offsets = [56, 0], sizes = [8, 128], strides = [1, 1]} : vector<64x128xf32> to vector<8x128xf32>
    %cst_47 = arith.constant dense<0.000000e+00> : vector<8x128xf32>
    %290 = tpu.matmul %269, %0, %cst_47 {dimension_numbers = #tpu.dot_dimension_numbers<[1], [0], [0], [1], [0, 0, 1, 1], [], []>} : vector<8x32xf32>, vector<32x128xf32>, vector<8x128xf32> -> vector<8x128xf32>
    %291 = arith.addf %289, %290 : vector<8x128xf32>
    %292 = math.tanh %291 : vector<8x128xf32>
    %293 = arith.negf %291 : vector<8x128xf32>
    %294 = math.exp %293 : vector<8x128xf32>
    %cst_48 = arith.constant 1.000000e+00 : f32
    %295 = vector.broadcast %cst_48 : f32 to vector<8x128xf32>
    %296 = arith.addf %295, %294 : vector<8x128xf32>
    %297 = arith.divf %295, %296 : vector<8x128xf32>
    %298 = arith.select %18, %292, %297 : vector<8x128xi1>, vector<8x128xf32>
    %299 = vector.extract_strided_slice %298 {offsets = [0, 0], sizes = [8, 32], strides = [1, 1]} : vector<8x128xf32> to vector<8x32xf32>
    %300 = vector.extract_strided_slice %298 {offsets = [0, 32], sizes = [8, 32], strides = [1, 1]} : vector<8x128xf32> to vector<8x32xf32>
    %301 = vector.extract_strided_slice %298 {offsets = [0, 64], sizes = [8, 32], strides = [1, 1]} : vector<8x128xf32> to vector<8x32xf32>
    %302 = vector.extract_strided_slice %298 {offsets = [0, 96], sizes = [8, 32], strides = [1, 1]} : vector<8x128xf32> to vector<8x32xf32>
    %303 = arith.mulf %300, %267 : vector<8x32xf32>
    %304 = arith.mulf %299, %301 : vector<8x32xf32>
    %305 = arith.addf %303, %304 : vector<8x32xf32>
    %306 = math.tanh %305 : vector<8x32xf32>
    %307 = arith.mulf %302, %306 : vector<8x32xf32>
    %308 = tpu.concatenate %307, %288 in 1 : vector<8x32xf32>, vector<8x32xf32> -> vector<8x64xf32>
    %cst_49 = arith.constant dense<0.000000e+00> : vector<8x128xf32>
    %309 = tpu.matmul %308, %1, %cst_49 {dimension_numbers = #tpu.dot_dimension_numbers<[1], [0], [0], [1], [0, 0, 1, 1], [], []>} : vector<8x64xf32>, vector<64x128xf32>, vector<8x128xf32> -> vector<8x128xf32>
    %310 = arith.addf %309, %4 : vector<8x128xf32>
    %311 = math.tanh %310 : vector<8x128xf32>
    %312 = arith.negf %310 : vector<8x128xf32>
    %313 = math.exp %312 : vector<8x128xf32>
    %cst_50 = arith.constant 1.000000e+00 : f32
    %314 = vector.broadcast %cst_50 : f32 to vector<8x128xf32>
    %315 = arith.addf %314, %313 : vector<8x128xf32>
    %316 = arith.divf %314, %315 : vector<8x128xf32>
    %317 = arith.select %18, %311, %316 : vector<8x128xi1>, vector<8x128xf32>
    %318 = vector.extract_strided_slice %317 {offsets = [0, 0], sizes = [8, 32], strides = [1, 1]} : vector<8x128xf32> to vector<8x32xf32>
    %319 = vector.extract_strided_slice %317 {offsets = [0, 32], sizes = [8, 32], strides = [1, 1]} : vector<8x128xf32> to vector<8x32xf32>
    %320 = vector.extract_strided_slice %317 {offsets = [0, 64], sizes = [8, 32], strides = [1, 1]} : vector<8x128xf32> to vector<8x32xf32>
    %321 = vector.extract_strided_slice %317 {offsets = [0, 96], sizes = [8, 32], strides = [1, 1]} : vector<8x128xf32> to vector<8x32xf32>
    %322 = arith.mulf %319, %286 : vector<8x32xf32>
    %323 = arith.mulf %318, %320 : vector<8x32xf32>
    %324 = arith.addf %322, %323 : vector<8x32xf32>
    %325 = math.tanh %324 : vector<8x32xf32>
    %326 = arith.mulf %321, %325 : vector<8x32xf32>
    %327 = tpu.concatenate %60, %98, %136, %174, %212, %250, %288, %326 in 0 : vector<8x32xf32>, vector<8x32xf32>, vector<8x32xf32>, vector<8x32xf32>, vector<8x32xf32>, vector<8x32xf32>, vector<8x32xf32>, vector<8x32xf32> -> vector<64x32xf32>
    %328 = vector.broadcast %5 : vector<1x32xf32> to vector<64x32xf32>
    %329 = arith.mulf %327, %328 : vector<64x32xf32>
    %cst_51 = arith.constant dense<0.000000e+00> : vector<64xf32>
    %330 = vector.multi_reduction <add>, %329, %cst_51 [1] : vector<64x32xf32> to vector<64xf32>
    %331 = vector.shape_cast %330 : vector<64xf32> to vector<64x1xf32>
    %332 = vector.broadcast %6 : vector<1x1xf32> to vector<64x1xf32>
    %333 = arith.addf %331, %332 : vector<64x1xf32>
    %c0_52 = arith.constant 0 : index
    %c0_53 = arith.constant 0 : index
    %334 = vector.load %arg9[%c0_52, %c0_53] : memref<64x1xf32, #tpu.memory_space<vmem>>, vector<64x1xf32>
    tpu.vector_store %arg9[%c0_52, %c0_53], %333 {strides = array<i32>} : memref<64x1xf32, #tpu.memory_space<vmem>>, vector<64x1xf32>,
    return
  }
  func.func @transform_0(%arg0: i32) -> (i32, i32) {
    %c0_i32 = arith.constant 0 : i32
    %c0_i32_0 = arith.constant 0 : i32
    %c0_i32_1 = arith.constant 0 : i32
    return %c0_i32, %c0_i32_0 : i32, i32
  }
  func.func @transform_1(%arg0: i32) -> (i32, i32) {
    %c0_i32 = arith.constant 0 : i32
    %c0_i32_0 = arith.constant 0 : i32
    %c0_i32_1 = arith.constant 0 : i32
    return %c0_i32, %c0_i32_0 : i32, i32
  }
  func.func @transform_2(%arg0: i32) -> (i32, i32) {
    %c0_i32 = arith.constant 0 : i32
    %c0_i32_0 = arith.constant 0 : i32
    %c0_i32_1 = arith.constant 0 : i32
    return %c0_i32, %c0_i32_0 : i32, i32
  }
  func.func @transform_3(%arg0: i32) -> (i32, i32) {
    %c0_i32 = arith.constant 0 : i32
    %c0_i32_0 = arith.constant 0 : i32
    %c0_i32_1 = arith.constant 0 : i32
    return %c0_i32, %c0_i32_0 : i32, i32
  }
  func.func @transform_4(%arg0: i32) -> (i32, i32) {
    %c0_i32 = arith.constant 0 : i32
    %c0_i32_0 = arith.constant 0 : i32
    %c0_i32_1 = arith.constant 0 : i32
    return %c0_i32, %c0_i32_0 : i32, i32
  }
  func.func @transform_5(%arg0: i32) -> (i32, i32) {
    %c0_i32 = arith.constant 0 : i32
    %c0_i32_0 = arith.constant 0 : i32
    %c0_i32_1 = arith.constant 0 : i32
    return %c0_i32, %c0_i32_0 : i32, i32
  }
  func.func @transform_6(%arg0: i32) -> (i32, i32) {
    %c0_i32 = arith.constant 0 : i32
    %c0_i32_0 = arith.constant 0 : i32
    %c0_i32_1 = arith.constant 0 : i32
    return %c0_i32, %c0_i32_0 : i32, i32
  }
  func.func @transform_7(%arg0: i32) -> (i32, i32) {
    %c0_i32 = arith.constant 0 : i32
    %c0_i32_0 = arith.constant 0 : i32
    %c0_i32_1 = arith.constant 0 : i32
    return %c0_i32, %c0_i32_0 : i32, i32
  }
  func.func @transform_8(%arg0: i32) -> (i32, i32) {
    %c0_i32 = arith.constant 0 : i32
    %c0_i32_0 = arith.constant 0 : i32
    %c0_i32_1 = arith.constant 0 : i32
    return %c0_i32, %c0_i32_0 : i32, i32
  }
}

</mosaic_0001>

<bundles_post_ra>
// kernel: tpu_custom_call.1
= control target key start
LH: loop header
LB: loop body
LE: loop exit
PB: predicated region body
PF: predicated region fallthrough
CT: control target
= control target key end

     0   :  { %s3234_s0 = inlined_call_operand.vmem [shape: f32[64,8], index: 0, kind: input, shape index: {}]   ;;  %s3235_s1 = inlined_call_operand.vmem [shape: f32[8,128], index: 1, kind: input, shape index: {}]   ;;  %s3236_s2 = inlined_call_operand.vmem [shape: f32[1,128], index: 2, kind: input, shape index: {}]   ;;  %s3237_s3 = inlined_call_operand.hbm [shape: f32[32,128], index: 3, kind: input, shape index: {}]   ;;  %s3238_s4 = inlined_call_operand.vmem [shape: f32[64,128], index: 4, kind: input, shape index: {}]   ;;  %s3239_s5 = inlined_call_operand.vmem [shape: f32[1,128], index: 5, kind: input, shape index: {}]   ;;  %s3240_s6 = inlined_call_operand.vmem [shape: f32[1,32], index: 6, kind: input, shape index: {}]   ;;  %s3241_s7 = inlined_call_operand.<no memory space> [shape: f32[1,1], index: 7, kind: input, shape index: {}]   ;;  %s3242_s8 = inlined_call_operand.vmem [shape: f32[64,1], index: 8, kind: output, shape index: {}]  }
   0x1   :  { %v13_v0 = vstv %s3241_s7 }
   0x2   :  { %14 = vst [vmem:[#allocation2] sm:$0x1] %v13_v0 }
   0x3   :  { %15 = vsyncpa [#allocation4], 0  ;;  %s2546_s29 = smov [#allocation3]  }
   0x4   :  { %s27_s30 = sshll.u32 %s2546_s29, 4  ;;  %s28_s30 = int_to_ptr.vmem [resolvable:$true] %s27_s30 }
   0x5   :  { %s2532_s9 = scalar_lea.vmem %s28_s30, 512  ;;  %p2537_p1 = scmp.lt.s32.totalorder %s28_s30, %s28_s30 }
   0x6   :  { %p2533_p0 = scmp.ne.s32.totalorder %s28_s30, %s2532_s9  ;;  %p2538_p2 = scmp.lt.s32.totalorder %s2532_s9, %s2532_s9 }
   0x8   :  { %p2539_p3 = por %p2538_p2, %p2537_p1 }
   0xa   :  { %p2540_p4 = pnand %p2539_p3, %p2533_p0 }
   0xc   :  { %2543 = shalt.err (!%p2540_p4)
}
   0xd   :  { %s2547_s10 = smov 128   ;;  %s2548_s11 = smov 8  }
   0xe   :  { %33 = dma.hbm_to_vmem [thread:$0]  %s3237_s3, 512, %s28_s30, [#allocation4], %s2547_s10, %s2547_s10, %s2548_s11  }
   0xf   :  { %2544 = dma.done.wait [#allocation4], 512  }
  0x10   :  { %2545 = vsyncadd [#allocation4], 4294966784  ;;  %v2549_v1 = vmov 0.0   ;;  %vm2550_vm0 = vmmov 0   ;;  %vm82_vm1 = vcmask 64512   ;;  %v74_v2 = vld [vmem:[%s3235_s1] sm:$0xff]  ;;  %v212_v19 = vlaneseq }
  0x11   :  { %2134 = vmatprep.subr.mxu1 %v2549_v1  ;;  %2142 = vmatprep.mubr.msk.f32.mxu1 %vm2550_vm0, %v2549_v1  ;;  %v2611_v3 = vld [vmem:[#allocation3 + $0x18] sm:$0xff]  ;;  %v67_v5 = vld [vmem:[%s3234_s0 + $0x8] sm:$0xff]  ;;  %v2620_v6 = vld [vmem:[#allocation3 + $0x10] sm:$0xff]  ;;  %s2551_s19 = smov 64   ;;  %s2552_s20 = smov 32   ;;  %vm217_vm5 = vcmask 261120  }
  0x12   :  { %v66_v4 = vld [vmem:[%s3234_s0] sm:$0xff]  ;;  %2120 = vmatprep.subr.mxu0 %v74_v2  ;;  %2135 = vmatpush3.msra.mxu1 %v2611_v3  ;;  %v2625_v7 = vld [vmem:[#allocation3 + $0x8] sm:$0xff]  ;;  %v213_v20 = vand.u32 127, %v212_v19  ;;  %v2666_v30 = vld [vmem:[%s3238_s4 + $0x38] sm:$0xff]  ;;  %vm322_vm6 = vcmask 523264   ;;  %vm1942_vm7 = vcmask 7168  }
  0x13   :  { %2121 = vmatpush3.msra.mxu0 %v74_v2  ;;  %2122 = vmatprep.mubr.msk.f32.mxu0 %vm82_vm1, %v66_v4  ;;  %v2630_v8 = vld [vmem:[#allocation3] sm:$0xff]  ;;  %v2644_v10 = vld [vmem:[%s3236_s2] ss:$0 sm:$0xff]  ;;  %v68_v31 = vld [vmem:[%s3234_s0 + $0x10] sm:$0xff] }
  0x14   :  { %2136 = vmatprep.subr.mxu1 %v2549_v1  ;;  %2123 = vmatmul.mubr.msk.f32.vlgmr.msra.gmra.mxu0 %vm82_vm1, %v67_v5  ;;  %vm214_vm2 = vcmp.ge.s32.totalorder %v213_v20, 64  ;;  %vm215_vm3 = vcmp.lt.s32.totalorder %v213_v20, 96  ;;  %v69_v32 = vld [vmem:[%s3234_s0 + $0x18] sm:$0xff]  ;;  %v2679_v33 = vld [vmem:[%s3238_s4 + $0x30] sm:$0xff]  ;;  %v70_v34 = vld [vmem:[%s3234_s0 + $0x20] sm:$0xff] }
  0x15   :  { %2137 = vmatpush3.msra.mxu1 %v2620_v6  ;;  %2145 = vmatprep.subr.mxu0 %v2549_v1  ;;  %vm2647_vm4 = vmand %vm214_vm2, %vm215_vm3  ;;  %v2689_v35 = vld [vmem:[%s3238_s4 + $0x28] sm:$0xff]  ;;  %v2700_v37 = vld [vmem:[%s3238_s4 + $0x20] sm:$0xff] }
  0x16   :  { %2138 = vmatprep.subr.mxu1 %v2549_v1  ;;  %2146 = vmatpush3.msra.mxu0 %v2666_v30  ;;  %v71_v36 = vld [vmem:[%s3234_s0 + $0x28] sm:$0xff]  ;;  %v72_v38 = vld [vmem:[%s3234_s0 + $0x30] sm:$0xff]  ;;  %v2713_v39 = vld [vmem:[%s3238_s4 + $0x18] sm:$0xff] }
  0x17   :  { %2139 = vmatpush3.msra.mxu1 %v2625_v7  ;;  %2125 = vmatprep.mubr.msk.f32.mxu0 %vm82_vm1, %v68_v31  ;;  %v73_v40 = vld [vmem:[%s3234_s0 + $0x38] sm:$0xff]  ;;  %v2724_v41 = vld [vmem:[%s3238_s4 + $0x10] sm:$0xff]  ;;  %v2734_v43 = vld [vmem:[%s3238_s4 + $0x8] sm:$0xff]  ;;  %s2553_s0 = smov 96  }
  0x18   :  { %2140 = vmatprep.subr.mxu1 %v2549_v1  ;;  %2147 = vmatprep.subr.mxu0 %v2549_v1  ;;  %v2742_v44 = vld [vmem:[%s3238_s4] sm:$0xff] }
  0x19   :  { %2141 = vmatpush3.msra.mxu1 %v2630_v8  ;;  %2126 = vmatmul.mubr.msk.f32.gmra.mxu0 %vm82_vm1, %v69_v32  ;;  %v2802_v55 = vld [vmem:[%s3239_s5] ss:$0 sm:$0xff] }
  0x1a   :  { %2143 = vmatmul.mubr.f32.vlgmr.msra.gmra.mxu1 %v2549_v1  ;;  %2175 = vmatprep.subr.mxu1 %v2549_v1 }
  0x1b   :  { %2191 = vmatprep.mubr.msk.f32.mxu1 %vm2550_vm0, %v2549_v1  ;;  %2148 = vmatpush3.msra.mxu0 %v2679_v33 }
  0x1c   :  { %2128 = vmatprep.mubr.msk.f32.mxu0 %vm82_vm1, %v70_v34  ;;  %2149 = vmatprep.subr.mxu0 %v2549_v1 }
  0x1d   :  { %2176 = vmatpush3.msra.mxu1 %v2666_v30  ;;  %2150 = vmatpush3.msra.mxu0 %v2689_v35 }
  0x1e   :  { %2177 = vmatprep.subr.mxu1 %v2549_v1  ;;  %2151 = vmatprep.subr.mxu0 %v2549_v1 }
  0x1f   :  { %2129 = vmatmul.mubr.msk.f32.gmra.mxu0 %vm82_vm1, %v71_v36  ;;  %2178 = vmatpush3.msra.mxu1 %v2679_v33 }
  0x20   :  { %2152 = vmatpush3.msra.mxu0 %v2700_v37  ;;  %2131 = vmatprep.mubr.msk.f32.mxu0 %vm82_vm1, %v72_v38 }
  0x21   :  { %2153 = vmatprep.subr.mxu0 %v2549_v1  ;;  %2179 = vmatprep.subr.mxu1 %v2549_v1 }
  0x22   :  { %2154 = vmatpush3.msra.mxu0 %v2713_v39  ;;  %2180 = vmatpush3.msra.mxu1 %v2689_v35 }
  0x23   :  { %2155 = vmatprep.subr.mxu0 %v2549_v1  ;;  %2132 = vmatmul.mubr.msk.f32.gmra.mxu0 %vm82_vm1, %v73_v40 }
  0x24   :  { %2156 = vmatpush3.msra.mxu0 %v2724_v41  ;;  %2161 = vmatprep.mubr.msk.f32.mxu0 %vm2550_vm0, %v2549_v1 }
  0x25   :  { %2157 = vmatprep.subr.mxu0 %v2549_v1  ;;  %2181 = vmatprep.subr.mxu1 %v2549_v1 }
  0x26   :  { %2158 = vmatpush3.msra.mxu0 %v2734_v43  ;;  %2182 = vmatpush3.msra.mxu1 %v2700_v37 }
  0x27   :  { %2159 = vmatprep.subr.mxu0 %v2549_v1  ;;  %2183 = vmatprep.subr.mxu1 %v2549_v1 }
  0x28   :  { %2160 = vmatpush3.msra.mxu0 %v2742_v44  ;;  %2184 = vmatpush3.msra.mxu1 %v2713_v39 }
  0x29   :  { %2164 = vmatprep.subr.mxu0 %v2549_v1  ;;  %2185 = vmatprep.subr.mxu1 %v2549_v1 }
  0x2a   :  { %2186 = vmatpush3.msra.mxu1 %v2724_v41 }
  0x2b   :  { %2187 = vmatprep.subr.mxu1 %v2549_v1 }
  0x2c   :  { %2188 = vmatpush3.msra.mxu1 %v2734_v43 }
  0x2d   :  { %2189 = vmatprep.subr.mxu1 %v2549_v1 }
  0x2e   :  { %2190 = vmatpush3.msra.mxu1 %v2742_v44 }
  0x2f   :  { %2224 = vmatprep.subr.mxu1 %v2549_v1 }
  0xd4   :  { %v2639_v9 = vpop.f32.mrf.mxu0 }
  0xd5   :  { %v179_v60 = vadd.f32 %v2639_v9, %v2644_v10 }
  0xd6   :  { %v173_v11 = vpop.f32.mrf.mxu0 }
  0xd7   :  { %v174_v12 = vadd.f32 %v2644_v10, %v173_v11 }
  0xd9   :  { %v2787_v49 = vpop.f32.mrf.mxu0 }
  0xda   :  { %v287_v13 = vpop.f32.mrf.mxu1 }
  0xdb   :  { %v291_v14 = vadd.f32 %v287_v13, %v174_v12  ;;  %v2789_v50 = vpop.f32.mrf.mxu0 }
  0xdc   :  { %v2144_v15 = vpop.f32.mrf.mxu1 }
  0xdd   :  { %v1966_v16 = vmul.f32 -1.442695, %v291_v14 }
  0xdf   :  { %2382 = vpow2.f32 %v1966_v16  ;;  %v2791_v51 = vpop.f32.mrf.mxu0 }
  0xe0   :  { %2384 = vtanh.f32 %v291_v14 }
  0xe1   :  { %v2793_v52 = vpop.f32.mrf.mxu0 }
  0xe3   :  { %v2795_v53 = vpop.f32.mrf.mxu0 }
  0xe5   :  { %v2797_v54 = vpop.f32.mrf.mxu0 }
  0xec   :  { %v2383_v17 = vpop.eup %2382 }
  0xed   :  { %v296_v18 = vadd.f32 1.0, %v2383_v17  ;;  %v2385_v22 = vpop.eup %2384 }
  0xef   :  { %2386 = vrcp.f32 %v296_v18 }
  0xfc   :  { %v2387_v23 = vpop.eup %2386 }
  0xfd   :  { %v2653_v24 = vsel %vm2647_vm4, %v2385_v22, %v2387_v23 }
  0xfe   :  { %302 = vrot.lane.b32.xlu0 %v2653_v24, %s2551_s19  ;;  %v300_v27 = vmul.f32 0.0, %v2653_v24 }
 0x170   :  { %v303_v25 = vpop.permute.xlu0 %302 }
 0x171   :  { %v305_v26 = vmul.f32 %v303_v25, %v2653_v24 }
 0x173   :  { %307 = vrot.lane.b32.xlu0 %v305_v26, %s2552_s20 }
 0x1e5   :  { %v308_v28 = vpop.permute.xlu0 %307 }
 0x1e6   :  { %v2660_v29 = vadd.f32 %v308_v28, %v300_v27 }
 0x1e8   :  { %2388 = vtanh.f32 %v2660_v29 }
 0x1f5   :  { %v2389_v42 = vpop.eup %2388 }
 0x1f6   :  { %313 = vrot.lane.b32.xlu1 %v2389_v42, %s2551_s19 }
 0x268   :  { %v314_v45 = vpop.permute.xlu1 %313 }
 0x269   :  { %v316_v46 = vmul.f32 %v314_v45, %v2653_v24  ;;  %v184_v45 = vadd.f32 %v2644_v10, %v2789_v50 }
 0x26b   :  { %318 = vrot.lane.b32.xlu1 %v316_v46, %s2552_s20 }
 0x2dd   :  { %v319_v47 = vpop.permute.xlu1 %318 }
 0x2de   :  { %v321_v48 = vsel %vm217_vm5, %v319_v47, 0.0 }
 0x2df   :  { %2162 = vmatmul.mubr.msk.f32.vlgmr.msra.gmra.mxu0 %vm322_vm6, %v321_v48 }
 0x2e0   :  { %2165 = vmatpush3.msra.mxu0 %v2611_v3  ;;  %2172 = vmatprep.mubr.msk.f32.mxu0 %vm2550_vm0, %v2549_v1 }
 0x2e1   :  { %2166 = vmatprep.subr.mxu0 %v2549_v1 }
 0x2e2   :  { %2167 = vmatpush3.msra.mxu0 %v2620_v6 }
 0x2e3   :  { %2168 = vmatprep.subr.mxu0 %v2549_v1 }
 0x2e4   :  { %2169 = vmatpush3.msra.mxu0 %v2625_v7 }
 0x2e5   :  { %2170 = vmatprep.subr.mxu0 %v2549_v1 }
 0x2e6   :  { %2171 = vmatpush3.msra.mxu0 %v2630_v8 }
 0x2e7   :  { %2173 = vmatmul.mubr.msk.f32.vlgmr.msra.gmra.mxu0 %vm217_vm5, %v319_v47  ;;  %2194 = vmatprep.subr.mxu0 %v2549_v1 }
 0x2e8   :  { %2195 = vmatpush3.msra.mxu0 %v2611_v3  ;;  %2202 = vmatprep.mubr.msk.f32.mxu0 %vm2550_vm0, %v2549_v1 }
 0x2e9   :  { %2196 = vmatprep.subr.mxu0 %v2549_v1 }
 0x2ea   :  { %2197 = vmatpush3.msra.mxu0 %v2620_v6 }
 0x2eb   :  { %2198 = vmatprep.subr.mxu0 %v2549_v1 }
 0x2ec   :  { %2199 = vmatpush3.msra.mxu0 %v2625_v7 }
 0x2ed   :  { %2200 = vmatprep.subr.mxu0 %v2549_v1 }
 0x2ee   :  { %2201 = vmatpush3.msra.mxu0 %v2630_v8 }
 0x2ef   :  { %2205 = vmatprep.subr.mxu0 %v2549_v1 }
 0x39f   :  { %v392_v56 = vpop.f32.mrf.mxu0 }
 0x3a0   :  { %v393_v57 = vadd.f32 %v2802_v55, %v392_v56 }
 0x3a1   :  { %v2163_v58 = vpop.f32.mrf.mxu0 }
 0x3a2   :  { %v1968_v59 = vmul.f32 -1.442695, %v393_v57 }
 0x3a4   :  { %2390 = vpow2.f32 %v1968_v59 }
 0x3a7   :  { %v489_v61 = vpop.f32.mrf.mxu0 }
 0x3a8   :  { %v493_v62 = vadd.f32 %v489_v61, %v179_v60 }
 0x3a9   :  { %v2174_v63 = vpop.f32.mrf.mxu0 }
 0x3aa   :  { %v1970_v0 = vmul.f32 -1.442695, %v493_v62 }
 0x3ac   :  { %2392 = vpow2.f32 %v1970_v0 }
 0x3ad   :  { %2394 = vtanh.f32 %v393_v57 }
 0x3b1   :  { %v2391_v2 = vpop.eup %2390 }
 0x3b2   :  { %v400_v4 = vadd.f32 1.0, %v2391_v2 }
 0x3b4   :  { %2396 = vrcp.f32 %v400_v4 }
 0x3b5   :  { %2398 = vtanh.f32 %v493_v62 }
 0x3b9   :  { %v2393_v5 = vpop.eup %2392 }
 0x3ba   :  { %v498_v11 = vadd.f32 1.0, %v2393_v5  ;;  %v2395_v12 = vpop.eup %2394 }
 0x3bc   :  { %2400 = vrcp.f32 %v498_v11 }
 0x3c1   :  { %v2397_v13 = vpop.eup %2396 }
 0x3c2   :  { %v403_v14 = vsel %vm2647_vm4, %v2395_v12, %v2397_v13  ;;  %v2399_v9 = vpop.eup %2398 }
 0x3c3   :  { %406 = vrot.lane.b32.xlu0 %v403_v14, %s2551_s19  ;;  %v404_v22 = vmul.f32 0.0, %v403_v14 }
 0x3c9   :  { %v2401_v15 = vpop.eup %2400 }
 0x3ca   :  { %v501_v16 = vsel %vm2647_vm4, %v2399_v9, %v2401_v15 }
 0x3cb   :  { %504 = vrot.lane.b32.xlu1 %v501_v16, %s2551_s19  ;;  %v502_v25 = vmul.f32 %v501_v16, %v2660_v29 }
 0x435   :  { %v407_v17 = vpop.permute.xlu0 %406 }
 0x436   :  { %v409_v18 = vmul.f32 %v407_v17, %v403_v14 }
 0x438   :  { %411 = vrot.lane.b32.xlu0 %v409_v18, %s2552_s20 }
 0x43d   :  { %v505_v19 = vpop.permute.xlu1 %504 }
 0x43e   :  { %v507_v20 = vmul.f32 %v505_v19, %v501_v16 }
 0x440   :  { %509 = vrot.lane.b32.xlu1 %v507_v20, %s2552_s20 }
 0x4aa   :  { %v412_v23 = vpop.permute.xlu0 %411 }
 0x4ab   :  { %v2815_v24 = vadd.f32 %v412_v23, %v404_v22 }
 0x4ad   :  { %2402 = vtanh.f32 %v2815_v24 }
 0x4b2   :  { %v510_v26 = vpop.permute.xlu1 %509 }
 0x4b3   :  { %v2819_v27 = vadd.f32 %v510_v26, %v502_v25 }
 0x4b5   :  { %2404 = vtanh.f32 %v2819_v27 }
 0x4ba   :  { %v2403_v28 = vpop.eup %2402 }
 0x4bb   :  { %417 = vrot.lane.b32.xlu0 %v2403_v28, %s2551_s19 }
 0x4c2   :  { %v2405_v31 = vpop.eup %2404 }
 0x4c3   :  { %515 = vrot.lane.b32.xlu1 %v2405_v31, %s2551_s19 }
 0x52d   :  { %v418_v32 = vpop.permute.xlu0 %417 }
 0x52e   :  { %v2824_v34 = vmul.f32 %v418_v32, %v403_v14 }
 0x530   :  { %524 = vrot.lane.b32.xlu1 %v2824_v34, %s2551_s19 }
 0x535   :  { %v516_v36 = vpop.permute.xlu1 %515 }
 0x536   :  { %v518_v38 = vmul.f32 %v516_v36, %v501_v16 }
 0x538   :  { %520 = vrot.lane.b32.xlu0 %v518_v38, %s2552_s20  ;;  %v189_v38 = vadd.f32 %v2787_v49, %v2644_v10 }
 0x5a2   :  { %v525_v29 = vpop.permute.xlu1 %524 }
 0x5aa   :  { %v521_v40 = vpop.permute.xlu0 %520 }
 0x5ab   :  { %v527_v42 = vsel %vm217_vm5, %v521_v40, %v525_v29  ;;  %2203 = vmatmul.mubr.msk.f32.vlgmr.msra.gmra.mxu0 %vm217_vm5, %v521_v40 }
 0x5ac   :  { %2192 = vmatmul.mubr.msk.f32.vlgmr.msra.gmra.mxu1 %vm322_vm6, %v527_v42  ;;  %2206 = vmatpush3.msra.mxu0 %v2666_v30 }
 0x5ad   :  { %2207 = vmatprep.subr.mxu0 %v2549_v1  ;;  %2225 = vmatpush3.msra.mxu1 %v2611_v3 }
 0x5ae   :  { %2208 = vmatpush3.msra.mxu0 %v2679_v33  ;;  %2226 = vmatprep.subr.mxu1 %v2549_v1 }
 0x5af   :  { %2209 = vmatprep.subr.mxu0 %v2549_v1  ;;  %2227 = vmatpush3.msra.mxu1 %v2620_v6 }
 0x5b0   :  { %2210 = vmatpush3.msra.mxu0 %v2689_v35  ;;  %2228 = vmatprep.subr.mxu1 %v2549_v1 }
 0x5b1   :  { %2211 = vmatprep.subr.mxu0 %v2549_v1  ;;  %2229 = vmatpush3.msra.mxu1 %v2625_v7 }
 0x5b2   :  { %2212 = vmatpush3.msra.mxu0 %v2700_v37  ;;  %2230 = vmatprep.subr.mxu1 %v2549_v1 }
 0x5b3   :  { %2213 = vmatprep.subr.mxu0 %v2549_v1  ;;  %2231 = vmatpush3.msra.mxu1 %v2630_v8 }
 0x5b4   :  { %2214 = vmatpush3.msra.mxu0 %v2713_v39  ;;  %2232 = vmatprep.mubr.msk.f32.mxu1 %vm2550_vm0, %v2549_v1 }
 0x5b5   :  { %2215 = vmatprep.subr.mxu0 %v2549_v1  ;;  %2221 = vmatprep.mubr.msk.f32.mxu0 %vm2550_vm0, %v2549_v1 }
 0x5b6   :  { %2216 = vmatpush3.msra.mxu0 %v2724_v41  ;;  %2235 = vmatprep.subr.mxu1 %v2549_v1 }
 0x5b7   :  { %2217 = vmatprep.subr.mxu0 %v2549_v1 }
 0x5b8   :  { %2218 = vmatpush3.msra.mxu0 %v2734_v43 }
 0x5b9   :  { %2219 = vmatprep.subr.mxu0 %v2549_v1 }
 0x5ba   :  { %2220 = vmatpush3.msra.mxu0 %v2742_v44 }
 0x5bb   :  { %2254 = vmatprep.subr.mxu0 %v2549_v1 }
 0x66b   :  { %v694_v46 = vpop.f32.mrf.mxu0 }
 0x66c   :  { %v698_v47 = vadd.f32 %v694_v46, %v184_v45  ;;  %v597_v48 = vpop.f32.mrf.mxu1 }
 0x66d   :  { %v598_v56 = vadd.f32 %v2802_v55, %v597_v48  ;;  %v2204_v57 = vpop.f32.mrf.mxu0 }
 0x66e   :  { %v1974_v58 = vmul.f32 -1.442695, %v698_v47  ;;  %v2193_v59 = vpop.f32.mrf.mxu1 }
 0x66f   :  { %v1972_v60 = vmul.f32 -1.442695, %v598_v56 }
 0x670   :  { %2406 = vpow2.f32 %v1974_v58 }
 0x671   :  { %2408 = vpow2.f32 %v1972_v60 }
 0x672   :  { %2410 = vtanh.f32 %v698_v47 }
 0x673   :  { %2412 = vtanh.f32 %v598_v56 }
 0x67d   :  { %v2407_v61 = vpop.eup %2406 }
 0x67e   :  { %v2409_v62 = vpop.eup %2408  ;;  %v703_v63 = vadd.f32 1.0, %v2407_v61 }
 0x67f   :  { %v605_v0 = vadd.f32 1.0, %v2409_v62  ;;  %v2411_v50 = vpop.eup %2410 }
 0x680   :  { %2414 = vrcp.f32 %v703_v63  ;;  %v2413_v2 = vpop.eup %2412 }
 0x681   :  { %2416 = vrcp.f32 %v605_v0 }
 0x68d   :  { %v2415_v4 = vpop.eup %2414 }
 0x68e   :  { %v2417_v5 = vpop.eup %2416  ;;  %v706_v11 = vsel %vm2647_vm4, %v2411_v50, %v2415_v4 }
 0x68f   :  { %709 = vrot.lane.b32.xlu1 %v706_v11, %s2551_s19  ;;  %v608_v12 = vsel %vm2647_vm4, %v2413_v2, %v2417_v5  ;;  %v707_v16 = vmul.f32 %v706_v11, %v2819_v27 }
 0x690   :  { %611 = vrot.lane.b32.xlu0 %v608_v12, %s2551_s19  ;;  %v609_v18 = vmul.f32 %v608_v12, %v2815_v24 }
 0x701   :  { %v710_v13 = vpop.permute.xlu1 %709 }
 0x702   :  { %v712_v14 = vmul.f32 %v710_v13, %v706_v11  ;;  %v612_v9 = vpop.permute.xlu0 %611 }
 0x703   :  { %v614_v15 = vmul.f32 %v612_v9, %v608_v12 }
 0x704   :  { %714 = vrot.lane.b32.xlu1 %v712_v14, %s2552_s20 }
 0x705   :  { %616 = vrot.lane.b32.xlu0 %v614_v15, %s2552_s20 }
 0x776   :  { %v715_v17 = vpop.permute.xlu1 %714 }
 0x777   :  { %v2873_v19 = vadd.f32 %v715_v17, %v707_v16  ;;  %v617_v20 = vpop.permute.xlu0 %616 }
 0x778   :  { %v2875_v22 = vadd.f32 %v617_v20, %v609_v18 }
 0x779   :  { %2418 = vtanh.f32 %v2873_v19 }
 0x77a   :  { %2420 = vtanh.f32 %v2875_v22 }
 0x786   :  { %v2419_v23 = vpop.eup %2418 }
 0x787   :  { %v2421_v25 = vpop.eup %2420  ;;  %720 = vrot.lane.b32.xlu1 %v2419_v23, %s2551_s19 }
 0x788   :  { %622 = vrot.lane.b32.xlu0 %v2421_v25, %s2551_s19 }
 0x7f9   :  { %v721_v26 = vpop.permute.xlu1 %720 }
 0x7fa   :  { %v723_v27 = vmul.f32 %v721_v26, %v706_v11  ;;  %v623_v28 = vpop.permute.xlu0 %622 }
 0x7fb   :  { %v2881_v31 = vmul.f32 %v623_v28, %v608_v12  ;;  %v194_v28 = vadd.f32 %v2644_v10, %v2793_v52 }
 0x7fc   :  { %725 = vrot.lane.b32.xlu0 %v723_v27, %s2552_s20 }
 0x7fd   :  { %729 = vrot.lane.b32.xlu1 %v2881_v31, %s2551_s19 }
 0x86e   :  { %v726_v24 = vpop.permute.xlu0 %725 }
 0x86f   :  { %v730_v32 = vpop.permute.xlu1 %729  ;;  %2233 = vmatmul.mubr.msk.f32.vlgmr.msra.gmra.mxu1 %vm217_vm5, %v726_v24 }
 0x870   :  { %v732_v36 = vsel %vm217_vm5, %v726_v24, %v730_v32  ;;  %2236 = vmatpush3.msra.mxu1 %v2666_v30  ;;  %2251 = vmatprep.mubr.msk.f32.mxu1 %vm2550_vm0, %v2549_v1 }
 0x871   :  { %2222 = vmatmul.mubr.msk.f32.vlgmr.msra.gmra.mxu0 %vm322_vm6, %v732_v36  ;;  %2237 = vmatprep.subr.mxu1 %v2549_v1 }
 0x872   :  { %2238 = vmatpush3.msra.mxu1 %v2679_v33  ;;  %2255 = vmatpush3.msra.mxu0 %v2611_v3 }
 0x873   :  { %2239 = vmatprep.subr.mxu1 %v2549_v1  ;;  %2256 = vmatprep.subr.mxu0 %v2549_v1 }
 0x874   :  { %2240 = vmatpush3.msra.mxu1 %v2689_v35  ;;  %2257 = vmatpush3.msra.mxu0 %v2620_v6 }
 0x875   :  { %2241 = vmatprep.subr.mxu1 %v2549_v1  ;;  %2258 = vmatprep.subr.mxu0 %v2549_v1 }
 0x876   :  { %2242 = vmatpush3.msra.mxu1 %v2700_v37  ;;  %2259 = vmatpush3.msra.mxu0 %v2625_v7 }
 0x877   :  { %2243 = vmatprep.subr.mxu1 %v2549_v1  ;;  %2260 = vmatprep.subr.mxu0 %v2549_v1 }
 0x878   :  { %2244 = vmatpush3.msra.mxu1 %v2713_v39  ;;  %2261 = vmatpush3.msra.mxu0 %v2630_v8 }
 0x879   :  { %2245 = vmatprep.subr.mxu1 %v2549_v1  ;;  %2262 = vmatprep.mubr.msk.f32.mxu0 %vm2550_vm0, %v2549_v1 }
 0x87a   :  { %2246 = vmatpush3.msra.mxu1 %v2724_v41  ;;  %2265 = vmatprep.subr.mxu0 %v2549_v1 }
 0x87b   :  { %2247 = vmatprep.subr.mxu1 %v2549_v1 }
 0x87c   :  { %2248 = vmatpush3.msra.mxu1 %v2734_v43 }
 0x87d   :  { %2249 = vmatprep.subr.mxu1 %v2549_v1 }
 0x87e   :  { %2250 = vmatpush3.msra.mxu1 %v2742_v44 }
 0x87f   :  { %2284 = vmatprep.subr.mxu1 %v2549_v1 }
 0x92f   :  { %v899_v29 = vpop.f32.mrf.mxu1 }
 0x930   :  { %v903_v40 = vadd.f32 %v899_v29, %v189_v38 }
 0x931   :  { %v802_v42 = vpop.f32.mrf.mxu0  ;;  %v2234_v45 = vpop.f32.mrf.mxu1 }
 0x932   :  { %v1978_v46 = vmul.f32 -1.442695, %v903_v40  ;;  %v803_v47 = vadd.f32 %v2802_v55, %v802_v42 }
 0x933   :  { %v2223_v48 = vpop.f32.mrf.mxu0 }
 0x934   :  { %2422 = vpow2.f32 %v1978_v46  ;;  %v1976_v56 = vmul.f32 -1.442695, %v803_v47 }
 0x936   :  { %2424 = vpow2.f32 %v1976_v56 }
 0x937   :  { %2426 = vtanh.f32 %v903_v40 }
 0x941   :  { %v2423_v57 = vpop.eup %2422 }
 0x942   :  { %v908_v58 = vadd.f32 1.0, %v2423_v57 }
 0x943   :  { %v2425_v59 = vpop.eup %2424 }
 0x944   :  { %2428 = vrcp.f32 %v908_v58  ;;  %v810_v60 = vadd.f32 1.0, %v2425_v59  ;;  %v2427_v49 = vpop.eup %2426 }
 0x945   :  { %2430 = vtanh.f32 %v803_v47 }
 0x946   :  { %2432 = vrcp.f32 %v810_v60 }
 0x951   :  { %v2429_v61 = vpop.eup %2428 }
 0x952   :  { %v2431_v62 = vpop.eup %2430  ;;  %v911_v63 = vsel %vm2647_vm4, %v2427_v49, %v2429_v61 }
 0x953   :  { %v2433_v0 = vpop.eup %2432  ;;  %914 = vrot.lane.b32.xlu1 %v911_v63, %s2551_s19  ;;  %v912_v12 = vmul.f32 %v911_v63, %v2873_v19 }
 0x954   :  { %v813_v50 = vsel %vm2647_vm4, %v2431_v62, %v2433_v0 }
 0x955   :  { %816 = vrot.lane.b32.xlu0 %v813_v50, %s2551_s19  ;;  %v814_v9 = vmul.f32 %v813_v50, %v2875_v22 }
 0x9c5   :  { %v915_v2 = vpop.permute.xlu1 %914 }
 0x9c6   :  { %v917_v4 = vmul.f32 %v915_v2, %v911_v63 }
 0x9c7   :  { %v817_v5 = vpop.permute.xlu0 %816 }
 0x9c8   :  { %v819_v11 = vmul.f32 %v817_v5, %v813_v50  ;;  %919 = vrot.lane.b32.xlu1 %v917_v4, %s2552_s20 }
 0x9ca   :  { %821 = vrot.lane.b32.xlu0 %v819_v11, %s2552_s20 }
 0xa3a   :  { %v920_v13 = vpop.permute.xlu1 %919 }
 0xa3b   :  { %v2929_v14 = vadd.f32 %v920_v13, %v912_v12 }
 0xa3c   :  { %v822_v15 = vpop.permute.xlu0 %821 }
 0xa3d   :  { %2434 = vtanh.f32 %v2929_v14  ;;  %v2933_v16 = vadd.f32 %v822_v15, %v814_v9 }
 0xa3f   :  { %2436 = vtanh.f32 %v2933_v16 }
 0xa4a   :  { %v2435_v17 = vpop.eup %2434 }
 0xa4b   :  { %925 = vrot.lane.b32.xlu1 %v2435_v17, %s2551_s19 }
 0xa4c   :  { %v2437_v18 = vpop.eup %2436 }
 0xa4d   :  { %827 = vrot.lane.b32.xlu0 %v2437_v18, %s2551_s19 }
 0xabd   :  { %v926_v20 = vpop.permute.xlu1 %925 }
 0xabe   :  { %v928_v19 = vmul.f32 %v926_v20, %v911_v63 }
 0xabf   :  { %v828_v23 = vpop.permute.xlu0 %827 }
 0xac0   :  { %v2938_v25 = vmul.f32 %v828_v23, %v813_v50  ;;  %930 = vrot.lane.b32.xlu0 %v928_v19, %s2552_s20 }
 0xac2   :  { %934 = vrot.lane.b32.xlu1 %v2938_v25, %s2551_s19 }
 0xb32   :  { %v931_v22 = vpop.permute.xlu0 %930 }
 0xb33   :  { %2263 = vmatmul.mubr.msk.f32.vlgmr.msra.gmra.mxu0 %vm217_vm5, %v931_v22 }
 0xb34   :  { %v935_v26 = vpop.permute.xlu1 %934  ;;  %2266 = vmatpush3.msra.mxu0 %v2666_v30  ;;  %2281 = vmatprep.mubr.msk.f32.mxu0 %vm2550_vm0, %v2549_v1 }
 0xb35   :  { %v937_v27 = vsel %vm217_vm5, %v931_v22, %v935_v26  ;;  %2267 = vmatprep.subr.mxu0 %v2549_v1 }
 0xb36   :  { %2252 = vmatmul.mubr.msk.f32.vlgmr.msra.gmra.mxu1 %vm322_vm6, %v937_v27  ;;  %2268 = vmatpush3.msra.mxu0 %v2679_v33 }
 0xb37   :  { %2269 = vmatprep.subr.mxu0 %v2549_v1  ;;  %2285 = vmatpush3.msra.mxu1 %v2611_v3 }
 0xb38   :  { %2270 = vmatpush3.msra.mxu0 %v2689_v35  ;;  %2286 = vmatprep.subr.mxu1 %v2549_v1 }
 0xb39   :  { %2271 = vmatprep.subr.mxu0 %v2549_v1  ;;  %2287 = vmatpush3.msra.mxu1 %v2620_v6 }
 0xb3a   :  { %2272 = vmatpush3.msra.mxu0 %v2700_v37  ;;  %2288 = vmatprep.subr.mxu1 %v2549_v1 }
 0xb3b   :  { %2273 = vmatprep.subr.mxu0 %v2549_v1  ;;  %2289 = vmatpush3.msra.mxu1 %v2625_v7 }
 0xb3c   :  { %2274 = vmatpush3.msra.mxu0 %v2713_v39  ;;  %2290 = vmatprep.subr.mxu1 %v2549_v1 }
 0xb3d   :  { %2275 = vmatprep.subr.mxu0 %v2549_v1  ;;  %2291 = vmatpush3.msra.mxu1 %v2630_v8 }
 0xb3e   :  { %2276 = vmatpush3.msra.mxu0 %v2724_v41  ;;  %2292 = vmatprep.mubr.msk.f32.mxu1 %vm2550_vm0, %v2549_v1 }
 0xb3f   :  { %2277 = vmatprep.subr.mxu0 %v2549_v1  ;;  %2295 = vmatprep.subr.mxu1 %v2549_v1 }
 0xb40   :  { %2278 = vmatpush3.msra.mxu0 %v2734_v43 }
 0xb41   :  { %2279 = vmatprep.subr.mxu0 %v2549_v1 }
 0xb42   :  { %2280 = vmatpush3.msra.mxu0 %v2742_v44 }
 0xb43   :  { %2314 = vmatprep.subr.mxu0 %v2549_v1 }
 0xbf3   :  { %v1104_v24 = vpop.f32.mrf.mxu0 }
 0xbf4   :  { %v1108_v32 = vadd.f32 %v1104_v24, %v194_v28 }
 0xbf5   :  { %v2264_v36 = vpop.f32.mrf.mxu0 }
 0xbf6   :  { %v1982_v38 = vmul.f32 -1.442695, %v1108_v32  ;;  %v1007_v29 = vpop.f32.mrf.mxu1 }
 0xbf7   :  { %v1008_v40 = vadd.f32 %v2802_v55, %v1007_v29 }
 0xbf8   :  { %2438 = vpow2.f32 %v1982_v38  ;;  %v2253_v42 = vpop.f32.mrf.mxu1 }
 0xbf9   :  { %v1980_v45 = vmul.f32 -1.442695, %v1008_v40 }
 0xbfb   :  { %2440 = vpow2.f32 %v1980_v45 }
 0xbfc   :  { %2442 = vtanh.f32 %v1108_v32 }
 0xc05   :  { %v2439_v46 = vpop.eup %2438 }
 0xc06   :  { %v1113_v47 = vadd.f32 1.0, %v2439_v46 }
 0xc08   :  { %v2441_v48 = vpop.eup %2440  ;;  %2444 = vrcp.f32 %v1113_v47 }
 0xc09   :  { %v1015_v56 = vadd.f32 1.0, %v2441_v48  ;;  %2446 = vtanh.f32 %v1008_v40  ;;  %v2443_v52 = vpop.eup %2442 }
 0xc0b   :  { %2448 = vrcp.f32 %v1015_v56 }
 0xc15   :  { %v2445_v57 = vpop.eup %2444 }
 0xc16   :  { %v1116_v58 = vsel %vm2647_vm4, %v2443_v52, %v2445_v57  ;;  %v2447_v59 = vpop.eup %2446 }
 0xc17   :  { %1119 = vrot.lane.b32.xlu1 %v1116_v58, %s2551_s19  ;;  %v1117_v50 = vmul.f32 %v1116_v58, %v2929_v14 }
 0xc18   :  { %v2449_v60 = vpop.eup %2448 }
 0xc19   :  { %v1018_v49 = vsel %vm2647_vm4, %v2447_v59, %v2449_v60 }
 0xc1a   :  { %1021 = vrot.lane.b32.xlu0 %v1018_v49, %s2551_s19  ;;  %v1019_v5 = vmul.f32 %v1018_v49, %v2933_v16 }
 0xc89   :  { %v1120_v61 = vpop.permute.xlu1 %1119 }
 0xc8a   :  { %v1122_v62 = vmul.f32 %v1120_v61, %v1116_v58 }
 0xc8c   :  { %1124 = vrot.lane.b32.xlu1 %v1122_v62, %s2552_s20  ;;  %v1022_v63 = vpop.permute.xlu0 %1021 }
 0xc8d   :  { %v1024_v0 = vmul.f32 %v1022_v63, %v1018_v49 }
 0xc8f   :  { %1026 = vrot.lane.b32.xlu0 %v1024_v0, %s2552_s20 }
 0xcfe   :  { %v1125_v2 = vpop.permute.xlu1 %1124 }
 0xcff   :  { %v2986_v4 = vadd.f32 %v1125_v2, %v1117_v50 }
 0xd01   :  { %2450 = vtanh.f32 %v2986_v4  ;;  %v1027_v11 = vpop.permute.xlu0 %1026 }
 0xd02   :  { %v2990_v12 = vadd.f32 %v1027_v11, %v1019_v5 }
 0xd04   :  { %2452 = vtanh.f32 %v2990_v12 }
 0xd0e   :  { %v2451_v13 = vpop.eup %2450 }
 0xd0f   :  { %1130 = vrot.lane.b32.xlu1 %v2451_v13, %s2551_s19 }
 0xd11   :  { %v2453_v9 = vpop.eup %2452 }
 0xd12   :  { %1032 = vrot.lane.b32.xlu0 %v2453_v9, %s2551_s19 }
 0xd81   :  { %v1131_v15 = vpop.permute.xlu1 %1130 }
 0xd82   :  { %v1133_v14 = vmul.f32 %v1131_v15, %v1116_v58 }
 0xd84   :  { %1135 = vrot.lane.b32.xlu0 %v1133_v14, %s2552_s20  ;;  %v1033_v17 = vpop.permute.xlu0 %1032 }
 0xd85   :  { %v2996_v18 = vmul.f32 %v1033_v17, %v1018_v49 }
 0xd87   :  { %1139 = vrot.lane.b32.xlu1 %v2996_v18, %s2551_s19 }
 0xdf6   :  { %v1136_v16 = vpop.permute.xlu0 %1135 }
 0xdf7   :  { %2293 = vmatmul.mubr.msk.f32.vlgmr.msra.gmra.mxu1 %vm217_vm5, %v1136_v16 }
 0xdf8   :  { %2296 = vmatpush3.msra.mxu1 %v2666_v30  ;;  %2311 = vmatprep.mubr.msk.f32.mxu1 %vm2550_vm0, %v2549_v1 }
 0xdf9   :  { %v1140_v20 = vpop.permute.xlu1 %1139  ;;  %2297 = vmatprep.subr.mxu1 %v2549_v1 }
 0xdfa   :  { %v1142_v19 = vsel %vm217_vm5, %v1136_v16, %v1140_v20  ;;  %2298 = vmatpush3.msra.mxu1 %v2679_v33 }
 0xdfb   :  { %2282 = vmatmul.mubr.msk.f32.vlgmr.msra.gmra.mxu0 %vm322_vm6, %v1142_v19  ;;  %2299 = vmatprep.subr.mxu1 %v2549_v1 }
 0xdfc   :  { %2315 = vmatpush3.msra.mxu0 %v2611_v3  ;;  %2300 = vmatpush3.msra.mxu1 %v2689_v35  ;;  %v199_v3 = vadd.f32 %v2791_v51, %v2644_v10 }
 0xdfd   :  { %2316 = vmatprep.subr.mxu0 %v2549_v1  ;;  %2301 = vmatprep.subr.mxu1 %v2549_v1 }
 0xdfe   :  { %2317 = vmatpush3.msra.mxu0 %v2620_v6  ;;  %2302 = vmatpush3.msra.mxu1 %v2700_v37 }
 0xdff   :  { %2318 = vmatprep.subr.mxu0 %v2549_v1  ;;  %2303 = vmatprep.subr.mxu1 %v2549_v1 }
 0xe00   :  { %2319 = vmatpush3.msra.mxu0 %v2625_v7  ;;  %2304 = vmatpush3.msra.mxu1 %v2713_v39 }
 0xe01   :  { %2320 = vmatprep.subr.mxu0 %v2549_v1  ;;  %2305 = vmatprep.subr.mxu1 %v2549_v1 }
 0xe02   :  { %2321 = vmatpush3.msra.mxu0 %v2630_v8  ;;  %2322 = vmatprep.mubr.msk.f32.mxu0 %vm2550_vm0, %v2549_v1 }
 0xe03   :  { %2306 = vmatpush3.msra.mxu1 %v2724_v41  ;;  %2325 = vmatprep.subr.mxu0 %v2549_v1 }
 0xe04   :  { %2307 = vmatprep.subr.mxu1 %v2549_v1 }
 0xe05   :  { %2308 = vmatpush3.msra.mxu1 %v2734_v43 }
 0xe06   :  { %2309 = vmatprep.subr.mxu1 %v2549_v1 }
 0xe07   :  { %2310 = vmatpush3.msra.mxu1 %v2742_v44 }
 0xe08   :  { %2344 = vmatprep.subr.mxu1 %v2549_v1 }
 0xeb7   :  { %v1309_v6 = vpop.f32.mrf.mxu1 }
 0xeb8   :  { %v1313_v7 = vadd.f32 %v1309_v6, %v199_v3 }
 0xeb9   :  { %v2294_v8 = vpop.f32.mrf.mxu1 }
 0xeba   :  { %v1986_v23 = vmul.f32 -1.442695, %v1313_v7 }
 0xebb   :  { %v1212_v22 = vpop.f32.mrf.mxu0 }
 0xebc   :  { %2454 = vpow2.f32 %v1986_v23  ;;  %v1213_v26 = vadd.f32 %v2802_v55, %v1212_v22 }
 0xebd   :  { %v2283_v27 = vpop.f32.mrf.mxu0 }
 0xebe   :  { %v1984_v28 = vmul.f32 -1.442695, %v1213_v26 }
 0xec0   :  { %2456 = vpow2.f32 %v1984_v28 }
 0xec1   :  { %2458 = vtanh.f32 %v1313_v7 }
 0xec9   :  { %v2455_v24 = vpop.eup %2454 }
 0xeca   :  { %v1318_v32 = vadd.f32 1.0, %v2455_v24 }
 0xecc   :  { %2460 = vrcp.f32 %v1318_v32 }
 0xecd   :  { %v2457_v36 = vpop.eup %2456  ;;  %2462 = vtanh.f32 %v1213_v26 }
 0xece   :  { %v1220_v38 = vadd.f32 1.0, %v2457_v36  ;;  %v2459_v10 = vpop.eup %2458 }
 0xed0   :  { %2464 = vrcp.f32 %v1220_v38 }
 0xed9   :  { %v2461_v51 = vpop.eup %2460 }
 0xeda   :  { %v1321_v29 = vsel %vm2647_vm4, %v2459_v10, %v2461_v51  ;;  %v2463_v40 = vpop.eup %2462 }
 0xedb   :  { %1324 = vrot.lane.b32.xlu1 %v1321_v29, %s2551_s19  ;;  %v1322_v52 = vmul.f32 %v1321_v29, %v2986_v4 }
 0xedd   :  { %v2465_v42 = vpop.eup %2464 }
 0xede   :  { %v1223_v45 = vsel %vm2647_vm4, %v2463_v40, %v2465_v42 }
 0xedf   :  { %1226 = vrot.lane.b32.xlu0 %v1223_v45, %s2551_s19  ;;  %v1224_v59 = vmul.f32 %v1223_v45, %v2990_v12  ;;  %v2510_v12 = vld [vmem:[#allocation3 + $0x18] sm:$0xff] }
 0xf4d   :  { %v1325_v46 = vpop.permute.xlu1 %1324 }
 0xf4e   :  { %v1327_v47 = vmul.f32 %v1325_v46, %v1321_v29 }
 0xf50   :  { %1329 = vrot.lane.b32.xlu1 %v1327_v47, %s2552_s20 }
 0xf51   :  { %v1227_v48 = vpop.permute.xlu0 %1226 }
 0xf52   :  { %v1229_v56 = vmul.f32 %v1227_v48, %v1223_v45 }
 0xf54   :  { %1231 = vrot.lane.b32.xlu0 %v1229_v56, %s2552_s20 }
 0xfc2   :  { %v1330_v57 = vpop.permute.xlu1 %1329 }
 0xfc3   :  { %v3043_v58 = vadd.f32 %v1330_v57, %v1322_v52  ;;  %v2515_v52 = vld [vmem:[%s3238_s4 + $0x38] sm:$0xff]  ;;  %v2516_v57 = vld [vmem:[%s3238_s4 + $0x30] sm:$0xff] }
 0xfc5   :  { %2466 = vtanh.f32 %v3043_v58 }
 0xfc6   :  { %v1232_v60 = vpop.permute.xlu0 %1231 }
 0xfc7   :  { %v3047_v49 = vadd.f32 %v1232_v60, %v1224_v59  ;;  %v2517_v60 = vld [vmem:[%s3238_s4 + $0x28] sm:$0xff] }
 0xfc9   :  { %2468 = vtanh.f32 %v3047_v49 }
 0xfd2   :  { %v2467_v61 = vpop.eup %2466 }
 0xfd3   :  { %1335 = vrot.lane.b32.xlu1 %v2467_v61, %s2551_s19  ;;  %v2519_v61 = vld [vmem:[%s3238_s4 + $0x18] sm:$0xff] }
 0xfd6   :  { %v2469_v62 = vpop.eup %2468 }
 0xfd7   :  { %1237 = vrot.lane.b32.xlu0 %v2469_v62, %s2551_s19  ;;  %v2520_v62 = vld [vmem:[%s3238_s4 + $0x10] sm:$0xff] }
0x1045   :  { %v1336_v63 = vpop.permute.xlu1 %1335 }
0x1046   :  { %v1338_v0 = vmul.f32 %v1336_v63, %v1321_v29  ;;  %v2521_v63 = vld [vmem:[%s3238_s4 + $0x8] sm:$0xff] }
0x1048   :  { %1340 = vrot.lane.b32.xlu0 %v1338_v0, %s2552_s20  ;;  %v2522_v0 = vld [vmem:[%s3238_s4] sm:$0xff] }
0x1049   :  { %v1238_v50 = vpop.permute.xlu0 %1237 }
0x104a   :  { %v3053_v2 = vmul.f32 %v1238_v50, %v1223_v45 }
0x104c   :  { %1344 = vrot.lane.b32.xlu1 %v3053_v2, %s2551_s19 }
0x10ba   :  { %v1341_v4 = vpop.permute.xlu0 %1340 }
0x10bb   :  { %2323 = vmatmul.mubr.msk.f32.vlgmr.msra.gmra.mxu0 %vm217_vm5, %v1341_v4 }
0x10bc   :  { %2326 = vmatpush3.msra.mxu0 %v2666_v30  ;;  %2341 = vmatprep.mubr.msk.f32.mxu0 %vm2550_vm0, %v2549_v1  ;;  %v2511_v30 = vld [vmem:[#allocation3 + $0x10] sm:$0xff] }
0x10bd   :  { %2327 = vmatprep.subr.mxu0 %v2549_v1 }
0x10be   :  { %v1345_v5 = vpop.permute.xlu1 %1344  ;;  %2328 = vmatpush3.msra.mxu0 %v2679_v33  ;;  %v2512_v33 = vld [vmem:[#allocation3 + $0x8] sm:$0xff] }
0x10bf   :  { %v1347_v11 = vsel %vm217_vm5, %v1341_v4, %v1345_v5  ;;  %2329 = vmatprep.subr.mxu0 %v2549_v1 }
0x10c0   :  { %2312 = vmatmul.mubr.msk.f32.vlgmr.msra.gmra.mxu1 %vm322_vm6, %v1347_v11  ;;  %2330 = vmatpush3.msra.mxu0 %v2689_v35  ;;  %v2513_v35 = vld [vmem:[#allocation3] sm:$0xff] }
0x10c1   :  { %2345 = vmatpush3.msra.mxu1 %v2510_v12  ;;  %2331 = vmatprep.subr.mxu0 %v2549_v1 }
0x10c2   :  { %2346 = vmatprep.subr.mxu1 %v2549_v1  ;;  %2332 = vmatpush3.msra.mxu0 %v2700_v37  ;;  %v3086_v37 = vld [vmem:[%s3236_s2] ss:$0 sm:$0xff] }
0x10c3   :  { %2347 = vmatpush3.msra.mxu1 %v2511_v30  ;;  %2333 = vmatprep.subr.mxu0 %v2549_v1  ;;  %v209_v50 = vadd.f32 %v3086_v37, %v2795_v53 }
0x10c4   :  { %2348 = vmatprep.subr.mxu1 %v2549_v1  ;;  %2334 = vmatpush3.msra.mxu0 %v2713_v39  ;;  %v204_v39 = vadd.f32 %v3086_v37, %v2797_v54 }
0x10c5   :  { %2349 = vmatpush3.msra.mxu1 %v2512_v33  ;;  %2352 = vmatprep.mubr.msk.f32.mxu1 %vm2550_vm0, %v2549_v1 }
0x10c6   :  { %2350 = vmatprep.subr.mxu1 %v2549_v1  ;;  %2335 = vmatprep.subr.mxu0 %v2549_v1 }
0x10c7   :  { %2351 = vmatpush3.msra.mxu1 %v2513_v35  ;;  %2336 = vmatpush3.msra.mxu0 %v2724_v41 }
0x10c8   :  { %2337 = vmatprep.subr.mxu0 %v2549_v1  ;;  %2355 = vmatprep.subr.mxu1 %v2549_v1 }
0x10c9   :  { %2338 = vmatpush3.msra.mxu0 %v2734_v43 }
0x10ca   :  { %2339 = vmatprep.subr.mxu0 %v2549_v1 }
0x10cb   :  { %2340 = vmatpush3.msra.mxu0 %v2742_v44 }
0x117b   :  { %v1514_v13 = vpop.f32.mrf.mxu0 }
0x117c   :  { %v1518_v41 = vadd.f32 %v1514_v13, %v204_v39 }
0x117d   :  { %v2324_v9 = vpop.f32.mrf.mxu0 }
0x117e   :  { %v1990_v15 = vmul.f32 -1.442695, %v1518_v41 }
0x1180   :  { %2470 = vpow2.f32 %v1990_v15  ;;  %v1417_v14 = vpop.f32.mrf.mxu1 }
0x1181   :  { %v1418_v43 = vadd.f32 %v2802_v55, %v1417_v14 }
0x1182   :  { %v2313_v17 = vpop.f32.mrf.mxu1 }
0x1183   :  { %v1988_v16 = vmul.f32 -1.442695, %v1418_v43 }
0x1185   :  { %2472 = vpow2.f32 %v1988_v16 }
0x1186   :  { %2474 = vtanh.f32 %v1518_v41 }
0x118d   :  { %v2471_v44 = vpop.eup %2470 }
0x118e   :  { %v1523_v20 = vadd.f32 1.0, %v2471_v44 }
0x1190   :  { %2476 = vrcp.f32 %v1523_v20 }
0x1191   :  { %2478 = vtanh.f32 %v1418_v43 }
0x1192   :  { %v2473_v19 = vpop.eup %2472 }
0x1193   :  { %v1425_v3 = vadd.f32 1.0, %v2473_v19  ;;  %v2475_v54 = vpop.eup %2474 }
0x1195   :  { %2480 = vrcp.f32 %v1425_v3 }
0x119d   :  { %v2477_v6 = vpop.eup %2476 }
0x119e   :  { %v1526_v7 = vsel %vm2647_vm4, %v2475_v54, %v2477_v6  ;;  %v2479_v8 = vpop.eup %2478 }
0x119f   :  { %1529 = vrot.lane.b32.xlu1 %v1526_v7, %s2551_s19  ;;  %v1527_v32 = vmul.f32 %v1526_v7, %v3043_v58 }
0x11a2   :  { %v2481_v23 = vpop.eup %2480 }
0x11a3   :  { %v1428_v22 = vsel %vm2647_vm4, %v2479_v8, %v2481_v23 }
0x11a4   :  { %1431 = vrot.lane.b32.xlu0 %v1428_v22, %s2551_s19  ;;  %v1429_v10 = vmul.f32 %v1428_v22, %v3047_v49  ;;  %v2518_v49 = vld [vmem:[%s3238_s4 + $0x20] sm:$0xff] }
0x1211   :  { %v1530_v26 = vpop.permute.xlu1 %1529 }
0x1212   :  { %v1532_v27 = vmul.f32 %v1530_v26, %v1526_v7 }
0x1214   :  { %1534 = vrot.lane.b32.xlu1 %v1532_v27, %s2552_s20 }
0x1216   :  { %v1432_v28 = vpop.permute.xlu0 %1431 }
0x1217   :  { %v1434_v24 = vmul.f32 %v1432_v28, %v1428_v22 }
0x1219   :  { %1436 = vrot.lane.b32.xlu0 %v1434_v24, %s2552_s20 }
0x1286   :  { %v1535_v36 = vpop.permute.xlu1 %1534 }
0x1287   :  { %v3100_v38 = vadd.f32 %v1535_v36, %v1527_v32 }
0x1289   :  { %2482 = vtanh.f32 %v3100_v38 }
0x128b   :  { %v1437_v51 = vpop.permute.xlu0 %1436 }
0x128c   :  { %v3104_v29 = vadd.f32 %v1437_v51, %v1429_v10  ;;  %v2523_v51 = vld [vmem:[%s3239_s5] ss:$0 sm:$0xff] }
0x128e   :  { %2484 = vtanh.f32 %v3104_v29 }
0x1296   :  { %v2483_v40 = vpop.eup %2482 }
0x1297   :  { %1540 = vrot.lane.b32.xlu1 %v2483_v40, %s2551_s19 }
0x129b   :  { %v2485_v42 = vpop.eup %2484 }
0x129c   :  { %1442 = vrot.lane.b32.xlu0 %v2485_v42, %s2551_s19 }
0x1309   :  { %v1541_v45 = vpop.permute.xlu1 %1540 }
0x130a   :  { %v1543_v46 = vmul.f32 %v1541_v45, %v1526_v7 }
0x130c   :  { %1545 = vrot.lane.b32.xlu0 %v1543_v46, %s2552_s20 }
0x130e   :  { %v1443_v47 = vpop.permute.xlu0 %1442 }
0x130f   :  { %v3110_v48 = vmul.f32 %v1443_v47, %v1428_v22 }
0x1311   :  { %1549 = vrot.lane.b32.xlu1 %v3110_v48, %s2551_s19 }
0x137e   :  { %v1546_v56 = vpop.permute.xlu0 %1545 }
0x137f   :  { %2353 = vmatmul.mubr.msk.f32.vlgmr.msra.gmra.mxu1 %vm217_vm5, %v1546_v56 }
0x1380   :  { %2356 = vmatpush3.msra.mxu1 %v2515_v52  ;;  %2371 = vmatprep.mubr.msk.f32.mxu1 %vm2550_vm0, %v2549_v1 }
0x1381   :  { %2357 = vmatprep.subr.mxu1 %v2549_v1 }
0x1382   :  { %2358 = vmatpush3.msra.mxu1 %v2516_v57 }
0x1383   :  { %v1550_v58 = vpop.permute.xlu1 %1549  ;;  %2359 = vmatprep.subr.mxu1 %v2549_v1 }
0x1384   :  { %v1552_v59 = vsel %vm217_vm5, %v1546_v56, %v1550_v58  ;;  %2360 = vmatpush3.msra.mxu1 %v2517_v60 }
0x1385   :  { %2342 = vmatmul.mubr.msk.f32.vlgmr.msra.gmra.mxu0 %vm322_vm6, %v1552_v59  ;;  %2361 = vmatprep.subr.mxu1 %v2549_v1  ;;  %v1997_v59 = vld [vmem:[%s3240_s6] ss:$0 sm:$0xff] }
0x1386   :  { %2362 = vmatpush3.msra.mxu1 %v2518_v49 }
0x1387   :  { %2363 = vmatprep.subr.mxu1 %v2549_v1 }
0x1388   :  { %2364 = vmatpush3.msra.mxu1 %v2519_v61 }
0x1389   :  { %2365 = vmatprep.subr.mxu1 %v2549_v1 }
0x138a   :  { %2366 = vmatpush3.msra.mxu1 %v2520_v62 }
0x138b   :  { %2367 = vmatprep.subr.mxu1 %v2549_v1 }
0x138c   :  { %2368 = vmatpush3.msra.mxu1 %v2521_v63 }
0x138d   :  { %2369 = vmatprep.subr.mxu1 %v2549_v1 }
0x138e   :  { %2370 = vmatpush3.msra.mxu1 %v2522_v0 }
0x143f   :  { %v1719_v4 = vpop.f32.mrf.mxu1 }
0x1440   :  { %v1723_v5 = vadd.f32 %v1719_v4, %v209_v50 }
0x1441   :  { %v2354_v11 = vpop.f32.mrf.mxu1 }
0x1442   :  { %v1994_v12 = vmul.f32 -1.442695, %v1723_v5 }
0x1444   :  { %2486 = vpow2.f32 %v1994_v12 }
0x1445   :  { %v1622_v30 = vpop.f32.mrf.mxu0 }
0x1446   :  { %v1623_v33 = vadd.f32 %v2802_v55, %v1622_v30 }
0x1447   :  { %v2343_v35 = vpop.f32.mrf.mxu0 }
0x1448   :  { %v1992_v39 = vmul.f32 -1.442695, %v1623_v33 }
0x144a   :  { %2488 = vpow2.f32 %v1992_v39 }
0x144b   :  { %2490 = vtanh.f32 %v1723_v5 }
0x1451   :  { %v2487_v1 = vpop.eup %2486 }
0x1452   :  { %v1728_v13 = vadd.f32 1.0, %v2487_v1 }
0x1454   :  { %2492 = vrcp.f32 %v1728_v13 }
0x1455   :  { %2494 = vtanh.f32 %v1623_v33 }
0x1457   :  { %v2489_v41 = vpop.eup %2488 }
0x1458   :  { %v1630_v9 = vadd.f32 1.0, %v2489_v41  ;;  %v2491_v53 = vpop.eup %2490 }
0x145a   :  { %2496 = vrcp.f32 %v1630_v9 }
0x1461   :  { %v2493_v37 = vpop.eup %2492 }
0x1462   :  { %v1731_v15 = vsel %vm2647_vm4, %v2491_v53, %v2493_v37  ;;  %v2495_v14 = vpop.eup %2494 }
0x1463   :  { %1734 = vrot.lane.b32.xlu1 %v1731_v15, %s2551_s19  ;;  %v1732_v19 = vmul.f32 %v1731_v15, %v3100_v38 }
0x1467   :  { %v2497_v55 = vpop.eup %2496 }
0x1468   :  { %v1633_v43 = vsel %vm2647_vm4, %v2495_v14, %v2497_v55 }
0x1469   :  { %1636 = vrot.lane.b32.xlu0 %v1633_v43, %s2551_s19  ;;  %v1634_v6 = vmul.f32 %v1633_v43, %v3104_v29 }
0x14d5   :  { %v1735_v17 = vpop.permute.xlu1 %1734 }
0x14d6   :  { %v1737_v16 = vmul.f32 %v1735_v17, %v1731_v15 }
0x14d8   :  { %1739 = vrot.lane.b32.xlu1 %v1737_v16, %s2552_s20 }
0x14db   :  { %v1637_v44 = vpop.permute.xlu0 %1636 }
0x14dc   :  { %v1639_v20 = vmul.f32 %v1637_v44, %v1633_v43 }
0x14de   :  { %1641 = vrot.lane.b32.xlu0 %v1639_v20, %s2552_s20 }
0x154a   :  { %v1740_v3 = vpop.permute.xlu1 %1739 }
0x154b   :  { %v1742_v54 = vadd.f32 %v1740_v3, %v1732_v19 }
0x154d   :  { %2498 = vtanh.f32 %v1742_v54 }
0x1550   :  { %v1642_v7 = vpop.permute.xlu0 %1641 }
0x1551   :  { %v1644_v8 = vadd.f32 %v1642_v7, %v1634_v6 }
0x1553   :  { %2500 = vtanh.f32 %v1644_v8 }
0x155a   :  { %v2499_v23 = vpop.eup %2498 }
0x155b   :  { %1745 = vrot.lane.b32.xlu1 %v2499_v23, %s2551_s19 }
0x1560   :  { %v2501_v22 = vpop.eup %2500 }
0x1561   :  { %1647 = vrot.lane.b32.xlu0 %v2501_v22, %s2551_s19 }
0x15cd   :  { %v1746_v26 = vpop.permute.xlu1 %1745 }
0x15ce   :  { %v1748_v27 = vmul.f32 %v1746_v26, %v1731_v15 }
0x15d0   :  { %1750 = vrot.lane.b32.xlu0 %v1748_v27, %s2552_s20 }
0x15d3   :  { %v1648_v28 = vpop.permute.xlu0 %1647 }
0x15d4   :  { %v1650_v24 = vmul.f32 %v1648_v28, %v1633_v43  ;;  %v1998_v43 = vld [vmem:[#allocation2] ss:$0 sm:$0xff] }
0x15d6   :  { %1754 = vrot.lane.b32.xlu1 %v1650_v24, %s2551_s19 }
0x1642   :  { %v1751_v32 = vpop.permute.xlu0 %1750 }
0x1648   :  { %v1755_v36 = vpop.permute.xlu1 %1754 }
0x1649   :  { %v1757_v38 = vsel %vm217_vm5, %v1751_v32, %v1755_v36 }
0x164a   :  { %2372 = vmatmul.mubr.msk.f32.vlgmr.msra.gmra.mxu1 %vm322_vm6, %v1757_v38 }
0x170a   :  { %v1827_v10 = vpop.f32.mrf.mxu1 }
0x170b   :  { %v1828_v29 = vadd.f32 %v2523_v51, %v1827_v10 }
0x170c   :  { %v2373_v40 = vpop.f32.mrf.mxu1 }
0x170d   :  { %v1996_v42 = vmul.f32 -1.442695, %v1828_v29 }
0x170f   :  { %2502 = vpow2.f32 %v1996_v42 }
0x1710   :  { %2504 = vtanh.f32 %v1828_v29 }
0x171c   :  { %v2503_v45 = vpop.eup %2502 }
0x171d   :  { %v1835_v46 = vadd.f32 1.0, %v2503_v45  ;;  %v2505_v47 = vpop.eup %2504 }
0x171f   :  { %2506 = vrcp.f32 %v1835_v46 }
0x172c   :  { %v2507_v56 = vpop.eup %2506 }
0x172d   :  { %v1838_v52 = vsel %vm2647_vm4, %v2505_v47, %v2507_v56 }
0x172e   :  { %1841 = vrot.lane.b32.xlu0 %v1838_v52, %s2551_s19  ;;  %v1839_v60 = vmul.f32 %v1838_v52, %v1644_v8 }
0x17a0   :  { %v1842_v57 = vpop.permute.xlu0 %1841 }
0x17a1   :  { %v1844_v58 = vmul.f32 %v1842_v57, %v1838_v52 }
0x17a3   :  { %1846 = vrot.lane.b32.xlu1 %v1844_v58, %s2552_s20 }
0x17a7   :  { %1861 = vrot.lane.b32.xlu1 %v1997_v59, %s2553_s0 }
0x1815   :  { %v1847_v49 = vpop.permute.xlu1 %1846 }
0x1816   :  { %v1849_v61 = vadd.f32 %v1847_v49, %v1839_v60 }
0x1818   :  { %2508 = vtanh.f32 %v1849_v61 }
0x1819   :  { %v1862_v62 = vpop.permute.xlu1 %1861 }
0x181a   :  { %v1865_v21 = vmul.f32 %v1862_v62, %v2881_v31  ;;  %v1867_v63 = vmul.f32 %v1862_v62, %v2996_v18  ;;  %v1869_v0 = vmul.f32 %v1862_v62, %v3110_v48  ;;  %v1864_v4 = vmul.f32 %v1862_v62, %v2824_v34 }
0x181b   :  { %v1866_v5 = vmul.f32 %v1862_v62, %v2938_v25  ;;  %v1868_v31 = vmul.f32 %v1862_v62, %v3053_v2  ;;  %v1870_v18 = vmul.f32 %v1862_v62, %v1650_v24 }
0x181c   :  { %1882 = vrot.lane.b32.xlu1 %v1865_v21, %s2552_s20 }
0x1820   :  { %1886 = vrot.lane.b32.xlu1 %v1867_v63, %s2552_s20 }
0x1824   :  { %1890 = vrot.lane.b32.xlu1 %v1869_v0, %s2552_s20 }
0x1825   :  { %v2509_v50 = vpop.eup %2508 }
0x1826   :  { %1852 = vrot.lane.b32.xlu0 %v2509_v50, %s2551_s19 }
0x182a   :  { %1880 = vrot.lane.b32.xlu0 %v1864_v4, %s2552_s20 }
0x182e   :  { %1884 = vrot.lane.b32.xlu0 %v1866_v5, %s2552_s20 }
0x1832   :  { %1888 = vrot.lane.b32.xlu0 %v1868_v31, %s2552_s20 }
0x1836   :  { %1892 = vrot.lane.b32.xlu0 %v1870_v18, %s2552_s20 }
0x188e   :  { %v1883_v12 = vpop.permute.xlu1 %1882 }
0x188f   :  { %v1907_v9 = vsel %vm217_vm5, %v1883_v12, 0.0 }
0x1892   :  { %v1887_v25 = vpop.permute.xlu1 %1886 }
0x1893   :  { %v1913_v2 = vsel %vm217_vm5, %v1887_v25, 0.0 }
0x1896   :  { %v1891_v1 = vpop.permute.xlu1 %1890 }
0x1897   :  { %v1919_v13 = vsel %vm217_vm5, %v1891_v1, 0.0 }
0x1898   :  { %v1853_v48 = vpop.permute.xlu0 %1852 }
0x1899   :  { %v1855_v11 = vmul.f32 %v1853_v48, %v1838_v52 }
0x189b   :  { %v1871_v30 = vmul.f32 %v1862_v62, %v1855_v11 }
0x189c   :  { %v1881_v33 = vpop.permute.xlu0 %1880 }
0x189d   :  { %1894 = vrot.lane.b32.xlu1 %v1871_v30, %s2552_s20  ;;  %v1904_v34 = vsel %vm217_vm5, %v1881_v33, 0.0 }
0x189e   :  { %1905 = vadd.xlane.f32.xlu0 %v1904_v34 }
0x18a0   :  { %v1885_v35 = vpop.permute.xlu0 %1884 }
0x18a1   :  { %v1910_v39 = vsel %vm217_vm5, %v1885_v35, 0.0 }
0x18a2   :  { %1911 = vadd.xlane.f32.xlu0 %v1910_v39 }
0x18a4   :  { %v1889_v41 = vpop.permute.xlu0 %1888 }
0x18a5   :  { %v1916_v53 = vsel %vm217_vm5, %v1889_v41, 0.0 }
0x18a6   :  { %1914 = vadd.xlane.f32.xlu0 %v1913_v2 }
0x18a8   :  { %v1893_v37 = vpop.permute.xlu0 %1892 }
0x18a9   :  { %v1922_v15 = vsel %vm217_vm5, %v1893_v37, 0.0 }
0x18aa   :  { %1920 = vadd.xlane.f32.xlu0 %v1919_v13 }
0x18c1   :  { %1908 = vadd.xlane.f32.xlu1 %v1907_v9 }
0x18c5   :  { %1917 = vadd.xlane.f32.xlu1 %v1916_v53 }
0x18c9   :  { %1923 = vadd.xlane.f32.xlu1 %v1922_v15 }
0x190f   :  { %v1895_v14 = vpop.permute.xlu1 %1894 }
0x1910   :  { %v1925_v55 = vsel %vm217_vm5, %v1895_v14, 0.0 }
0x1911   :  { %1926 = vadd.xlane.f32.xlu0 %v1925_v55 }
0x1927   :  { %v1906_v17 = vpop.xlane.xlu0 %1905 }
0x1928   :  { %v1934_v16 = vadd.f32 %v1998_v43, %v1906_v17 }
0x192a   :  { %1943 = vst.msk [vmem:[%s3242_s8] sm:$0xff] %vm1942_vm7, %v1934_v16 }
0x192b   :  { %v1912_v44 = vpop.xlane.xlu0 %1911 }
0x192c   :  { %v1936_v20 = vadd.f32 %v1998_v43, %v1912_v44 }
0x192e   :  { %1945 = vst.msk [vmem:[%s3242_s8 + $0x10] sm:$0xff] %vm1942_vm7, %v1936_v20 }
0x192f   :  { %v1915_v19 = vpop.xlane.xlu0 %1914 }
0x1930   :  { %v1937_v3 = vadd.f32 %v1998_v43, %v1915_v19 }
0x1932   :  { %1946 = vst.msk [vmem:[%s3242_s8 + $0x18] sm:$0xff] %vm1942_vm7, %v1937_v3 }
0x1933   :  { %v1921_v54 = vpop.xlane.xlu0 %1920 }
0x1934   :  { %v1939_v6 = vadd.f32 %v1998_v43, %v1921_v54 }
0x1936   :  { %1948 = vst.msk [vmem:[%s3242_s8 + $0x28] sm:$0xff] %vm1942_vm7, %v1939_v6 }
0x194a   :  { %v1909_v7 = vpop.xlane.xlu1 %1908 }
0x194b   :  { %v1935_v8 = vadd.f32 %v1998_v43, %v1909_v7 }
0x194d   :  { %1944 = vst.msk [vmem:[%s3242_s8 + $0x8] sm:$0xff] %vm1942_vm7, %v1935_v8 }
0x194e   :  { %v1918_v23 = vpop.xlane.xlu1 %1917 }
0x194f   :  { %v1938_v22 = vadd.f32 %v1998_v43, %v1918_v23 }
0x1951   :  { %1947 = vst.msk [vmem:[%s3242_s8 + $0x20] sm:$0xff] %vm1942_vm7, %v1938_v22 }
0x1952   :  { %v1924_v26 = vpop.xlane.xlu1 %1923 }
0x1953   :  { %v1940_v27 = vadd.f32 %v1998_v43, %v1924_v26 }
0x1955   :  { %1949 = vst.msk [vmem:[%s3242_s8 + $0x30] sm:$0xff] %vm1942_vm7, %v1940_v27 }
0x199a   :  { %v1927_v28 = vpop.xlane.xlu0 %1926 }
0x199b   :  { %v1941_v24 = vadd.f32 %v1998_v43, %v1927_v28 }
0x199d   :  { %1950 = vst.msk [vmem:[%s3242_s8 + $0x38] sm:$0xff] %vm1942_vm7, %v1941_v24 }
0x199e   :  { %1955 = vsyncpa [#allocation4], 1 }

</bundles_post_ra>
